<compile_context>
chip_gen: v5e
topology: v5e:2x2
jax: 0.10.0
libtpu: 0.0.40
codegen_flags: <defaults>
</compile_context>

<pallas_src>
import functools
import math

import jax
import jax.numpy as jnp
from jax.experimental import pallas as pl
from jax.experimental.pallas import tpu as pltpu

SCALE = math.sqrt(0.5)  # torch.sqrt(torch.FloatTensor([0.5]))
LANE = 128


def _round_up(x, m):
    return ((x + m - 1) // m) * m


# ----------------------------- fused Pallas kernel -----------------------------

def _decoder_kernel(emb_ref, encct_ref, enck_ref,
                    w_e2h_ref, w_ah2e_ref, w_ae2h_ref, w_h2e_ref, w_fco_ref,
                    convw_ref, bias_ref,
                    out_ref, att_ref,
                    *, n_layers, K, H, E, S, T, B, S_pad, V_pad, pad_val):
    f32 = jnp.float32
    M = B * T

    emb = emb_ref[...]                        # (M, E)   batch folded into M
    emb_scaled = emb * SCALE                  # hoisted out of the layer loop

    # ---- loop-invariant values (layer loop is statically unrolled; JAX does
    # not CSE broadcasts/iotas, so build them once) ----
    b_e2h = bias_ref[0:1, :H]
    b_ah2e = bias_ref[1:2, :E]                # pre-scaled by SCALE in the wrapper
    b_ae2h = bias_ref[2:3, :H]
    b_h2e = bias_ref[3:4, :E]
    b_fco = bias_ref[4:5, :V_pad]

    encct = encct_ref[...]                    # (B, E, S_pad) pre-transposed encoder_conved
    enck = enck_ref[...]                      # (B, S_pad, E) encoder_combined

    # mask of real encoder positions; padded lanes -> -1e30 -> exp == exactly 0
    col_valid = jax.lax.broadcasted_iota(jnp.int32, (1, 1, S_pad), 2) < S
    neg = jnp.float32(-1e30)

    # per-row position inside its own sequence (keeps batches independent in
    # the flattened causal conv)
    row_local = jax.lax.broadcasted_iota(jnp.int32, (B, T, 1), 1).reshape(M, 1)
    pad_masks = {s: row_local < s for s in range(1, K)}
    pad_tops = {s: jnp.full((s, H), pad_val, f32) for s in range(1, K)}

    # conv_input = emb2hid(embedded)                                     (M, H)
    conv_input = jnp.dot(emb, w_e2h_ref[...], preferred_element_type=f32) + b_e2h

    attn = jnp.zeros((B, T, S_pad), f32)      # n_layers == 0 safety
    for l in range(n_layers):                 # static -> unrolled
        # ---- causal conv as K shifted MXU dots (no im2col scratch round trip) ----
        acc = (jnp.dot(conv_input, convw_ref[l, K - 1], preferred_element_type=f32)
               + bias_ref[5 + l:6 + l, :2 * H])
        for j in range(K - 1):
            s = (K - 1) - j                   # causal left-shift in rows
            shifted = jnp.concatenate([pad_tops[s], conv_input[:M - s, :]], axis=0)
            win = jnp.where(pad_masks[s], pad_val, shifted)   # no cross-batch leakage
            acc = acc + jnp.dot(win, convw_ref[l, j], preferred_element_type=f32)
        conved = acc[:, :H] * jax.nn.sigmoid(acc[:, H:])      # F.glu over channels

        # ---- attention (lane-dense: S padded to 128, masked exact softmax) ----
        conved_emb = (jnp.dot(conved, w_ah2e_ref[...], preferred_element_type=f32)
                      + b_ah2e)               # SCALE folded into weight/bias
        combined = (conved_emb + emb_scaled).reshape(B, T, E)
        energy = jnp.einsum('bte,bes->bts', combined, encct,
                            preferred_element_type=f32)       # (B, T, S_pad)
        energy = jnp.where(col_valid, energy, neg)
        m = jnp.max(energy, axis=-1, keepdims=True)
        ex = jnp.exp(energy - m)
        attn = ex / jnp.sum(ex, axis=-1, keepdims=True)       # exact softmax
        attended = jnp.einsum('bts,bse->bte', attn, enck,
                              preferred_element_type=f32)     # (B, T, E)
        attended_hid = (jnp.dot(attended.reshape(M, E), w_ae2h_ref[...],
                                preferred_element_type=f32) + b_ae2h)   # (M, H)

        # ---- fused residual epilogue ----
        conv_input = ((conved + attended_hid) * SCALE + conv_input) * SCALE

    # ---- final projections; fc_out weight/bias zero-padded to V_pad lanes so
    # both stores are single unmasked lane-dense writes ----
    conved_e = jnp.dot(conv_input, w_h2e_ref[...], preferred_element_type=f32) + b_h2e
    out_ref[...] = (jnp.dot(conved_e, w_fco_ref[...], preferred_element_type=f32)
                    + b_fco)                  # (M, V_pad)
    att_ref[...] = attn                       # (B, T, S_pad)


# ----------------------------- forward wrapper -----------------------------

def decoder_forward(trg, enc_conved, enc_combined, params,
                    n_layers, kernel_size, trg_pad_idx):
    B, T = trg.shape
    E = params["tok_emb"].shape[1]
    H = params["emb2hid_w"].shape[1]
    S = enc_conved.shape[1]
    V = params["fc_out_w"].shape[1]
    K = kernel_size
    M = B * T
    V_pad = _round_up(V, LANE)
    S_pad = _round_up(S, LANE)
    WB = _round_up(max(LANE, 2 * H, V_pad, E, H), LANE)

    # Embedding lookups (gathers) stay in XLA.
    # TODO(synk): token/position embedding gather is left to XLA; an in-kernel
    # version would need scalar-prefetch + pl.Element row gather (overkill here).
    pos = jnp.arange(T, dtype=jnp.int32)
    embedded = (jnp.take(params["tok_emb"], trg, axis=0)
                + jnp.take(params["pos_emb"], pos, axis=0)[None])      # (B, T, E)
    emb2d = embedded.reshape(M, E)

    # Lane-dense encoder tensors: pad S -> S_pad with zeros, pre-transpose conved.
    encc_p = jnp.zeros((B, S_pad, E), jnp.float32).at[:, :S, :].set(enc_conved)
    encc_t = jnp.transpose(encc_p, (0, 2, 1))                          # (B, E, S_pad)
    enck_p = jnp.zeros((B, S_pad, E), jnp.float32).at[:, :S, :].set(enc_combined)

    # Lane-dense fc_out weight; SCALE folded into the attn_hid2emb projection.
    fc_w = jnp.zeros((E, V_pad), jnp.float32).at[:, :V].set(params["fc_out_w"])
    w_ah2e = params["attn_hid2emb_w"] * SCALE

    # All biases packed into one small (rows, WB) slab -> single DMA / VMEM tile.
    n_rows = 5 + n_layers
    biases = jnp.zeros((n_rows, WB), jnp.float32)
    biases = biases.at[0, :H].set(params["emb2hid_b"])
    biases = biases.at[1, :E].set(params["attn_hid2emb_b"] * SCALE)
    biases = biases.at[2, :H].set(params["attn_emb2hid_b"])
    biases = biases.at[3, :E].set(params["hid2emb_b"])
    biases = biases.at[4, :V].set(params["fc_out_b"])
    for l in range(n_layers):
        biases = biases.at[5 + l, :2 * H].set(params["conv_b"][l])

    conv_w = params["conv_w"]                                          # (L, K, H, 2H)

    kernel = functools.partial(
        _decoder_kernel, n_layers=n_layers, K=K, H=H, E=E, S=S, T=T, B=B,
        S_pad=S_pad, V_pad=V_pad, pad_val=float(trg_pad_idx))

    # Advisory cost hint so XLA overlaps the gathers / output slices around the call.
    flops = 2 * M * E * H + 2 * M * H * E + 2 * M * E * V_pad
    flops += n_layers * (2 * M * (K * H) * (2 * H) + 2 * M * H * E
                         + 2 * M * E * S_pad + 2 * M * S_pad * E + 2 * M * E * H)
    transcendentals = n_layers * (M * H + M * S_pad)
    in_bytes = 4 * (emb2d.size + encc_t.size + enck_p.size
                    + params["emb2hid_w"].size + w_ah2e.size
                    + params["attn_emb2hid_w"].size + params["hid2emb_w"].size
                    + fc_w.size + conv_w.size + biases.size)
    out_bytes = 4 * (M * V_pad + B * T * S_pad)
    cost = pl.CostEstimate(flops=flops, transcendentals=transcendentals,
                           bytes_accessed=in_bytes + out_bytes)

    # Single grid step: everything fits in VMEM, batch is folded into M, so no
    # serial per-batch loop on single-TC chips (v5e/v6e).  For v7x with large
    # even B, a "parallel" batch grid axis could be reintroduced to use both TCs.
    out_pad, att_pad = pl.pallas_call(
        kernel,
        out_shape=(jax.ShapeDtypeStruct((M, V_pad), jnp.float32),
                   jax.ShapeDtypeStruct((B, T, S_pad), jnp.float32)),
        grid=(1,),
        in_specs=[
            pl.BlockSpec((M, E), lambda i: (0, 0)),                    # embedded (flat)
            pl.BlockSpec((B, E, S_pad), lambda i: (0, 0, 0)),          # enc_conved^T (padded)
            pl.BlockSpec((B, S_pad, E), lambda i: (0, 0, 0)),          # enc_combined (padded)
            pl.BlockSpec((E, H), lambda i: (0, 0)),                    # emb2hid_w
            pl.BlockSpec((H, E), lambda i: (0, 0)),                    # attn_hid2emb_w * SCALE
            pl.BlockSpec((E, H), lambda i: (0, 0)),                    # attn_emb2hid_w
            pl.BlockSpec((H, E), lambda i: (0, 0)),                    # hid2emb_w
            pl.BlockSpec((E, V_pad), lambda i: (0, 0)),                # fc_out_w (padded)
            pl.BlockSpec((n_layers, K, H, 2 * H), lambda i: (0, 0, 0, 0)),  # conv_w
            pl.BlockSpec((n_rows, WB), lambda i: (0, 0)),              # packed biases
        ],
        out_specs=(
            pl.BlockSpec((M, V_pad), lambda i: (0, 0)),
            pl.BlockSpec((B, T, S_pad), lambda i: (0, 0, 0)),
        ),
        compiler_params=pltpu.CompilerParams(dimension_semantics=("arbitrary",)),
        cost_estimate=cost,
    )(emb2d, encc_t, enck_p,
      params["emb2hid_w"], w_ah2e, params["attn_emb2hid_w"], params["hid2emb_w"],
      fc_w, conv_w, biases)

    output = out_pad.reshape(B, T, V_pad)[:, :, :V]
    attention = att_pad[:, :, :S]
    return output, attention


# ----------------------------- pure-JAX reference -----------------------------

def reference_forward(trg, enc_conved, enc_combined, params,
                      n_layers, kernel_size, trg_pad_idx):
    B, T = trg.shape
    H = params["emb2hid_w"].shape[1]
    pos = jnp.arange(T, dtype=jnp.int32)
    embedded = jnp.take(params["tok_emb"], trg, axis=0) + params["pos_emb"][pos][None]
    conv_input = embedded @ params["emb2hid_w"] + params["emb2hid_b"]
    attention = None
    for i in range(n_layers):
        pad = jnp.full((B, kernel_size - 1, H), float(trg_pad_idx), jnp.float32)
        xp = jnp.concatenate([pad, conv_input], axis=1)
        windows = jnp.stack([xp[:, j: j + T, :] for j in range(kernel_size)], axis=2)
        conv = jnp.einsum("btjc,jco->bto", windows, params["conv_w"][i]) + params["conv_b"][i]
        conved = conv[..., :H] * jax.nn.sigmoid(conv[..., H:])
        conved_emb = conved @ params["attn_hid2emb_w"] + params["attn_hid2emb_b"]
        combined = (conved_emb + embedded) * SCALE
        energy = jnp.einsum("bte,bse->bts", combined, enc_conved)
        attention = jax.nn.softmax(energy, axis=-1)
        attended = jnp.einsum("bts,bse->bte", attention, enc_combined)
        attended = attended @ params["attn_emb2hid_w"] + params["attn_emb2hid_b"]
        conved = ((conved + attended) * SCALE + conv_input) * SCALE
        conv_input = conved
    out = conved @ params["hid2emb_w"] + params["hid2emb_b"]
    out = out @ params["fc_out_w"] + params["fc_out_b"]
    return out, attention


# ----------------------------------- main -----------------------------------

if __name__ == "__main__":
    output_dim, emb_dim, hid_dim = 50, 32, 64
    n_layers, kernel_size, trg_pad_idx, max_length = 2, 3, 1, 100
    B, T, S = 2, 8, 10

    key = jax.random.PRNGKey(0)
    keys = jax.random.split(key, 17)

    def init(k, shape, scale=0.05):
        return (scale * jax.random.normal(k, shape)).astype(jnp.float32)

    params = dict(
        tok_emb=init(keys[0], (output_dim, emb_dim)),
        pos_emb=init(keys[1], (max_length, emb_dim)),
        emb2hid_w=init(keys[2], (emb_dim, hid_dim)),
        emb2hid_b=init(keys[3], (hid_dim,)),
        hid2emb_w=init(keys[4], (hid_dim, emb_dim)),
        hid2emb_b=init(keys[5], (emb_dim,)),
        attn_hid2emb_w=init(keys[6], (hid_dim, emb_dim)),
        attn_hid2emb_b=init(keys[7], (emb_dim,)),
        attn_emb2hid_w=init(keys[8], (emb_dim, hid_dim)),
        attn_emb2hid_b=init(keys[9], (hid_dim,)),
        fc_out_w=init(keys[10], (emb_dim, output_dim)),
        fc_out_b=init(keys[11], (output_dim,)),
        # conv weights stored as (layer, K, H, 2H): w[l, j] == torch W[:, :, j].T
        conv_w=init(keys[12], (n_layers, kernel_size, hid_dim, 2 * hid_dim)),
        conv_b=init(keys[13], (n_layers, 2 * hid_dim)),
    )

    trg = jax.random.randint(keys[14], (B, T), 0, output_dim).astype(jnp.int32)
    enc_conved = init(keys[15], (B, S, emb_dim), scale=0.5)
    enc_combined = init(keys[16], (B, S, emb_dim), scale=0.3)

    output, attention = decoder_forward(
        trg, enc_conved, enc_combined, params, n_layers, kernel_size, trg_pad_idx
    )
    output = jax.block_until_ready(output)
    attention = jax.block_until_ready(attention)

    ref_out, ref_attn = reference_forward(
        trg, enc_conved, enc_combined, params, n_layers, kernel_size, trg_pad_idx
    )
    assert output.shape == (B, T, output_dim)
    assert attention.shape == (B, T, S)
    assert jnp.allclose(output, ref_out, rtol=1e-3, atol=2e-4)
    assert jnp.allclose(attention, ref_attn, rtol=1e-3, atol=2e-4)

    print("KERNEL_OK")
</pallas_src>

<mosaic_0001>
module attributes {stable_mosaic.version = 11 : i64} {
  func.func @_decoder_kernel(%arg0: i32, %arg1: memref<16x32xf32, #tpu.memory_space<vmem>>, %arg2: memref<2x32x128xf32, #tpu.memory_space<vmem>>, %arg3: memref<2x128x32xf32, #tpu.memory_space<vmem>>, %arg4: memref<32x64xf32, #tpu.memory_space<vmem>>, %arg5: memref<64x32xf32, #tpu.memory_space<vmem>>, %arg6: memref<32x64xf32, #tpu.memory_space<vmem>>, %arg7: memref<64x32xf32, #tpu.memory_space<vmem>>, %arg8: memref<32x128xf32, #tpu.memory_space<vmem>>, %arg9: memref<2x3x64x128xf32, #tpu.memory_space<vmem>>, %arg10: memref<7x128xf32, #tpu.memory_space<vmem>>, %arg11: memref<16x128xf32, #tpu.memory_space<vmem>>, %arg12: memref<2x8x128xf32, #tpu.memory_space<vmem>>) attributes {dimension_semantics = [#tpu.dimension_semantics<arbitrary>], iteration_bounds = array<i64: 1>, scalar_prefetch = 0 : i64, scratch_operands = 0 : i64, tpu.core_type = #tpu.core_type<tc>, window_params = [{pipeline_mode = #tpu.pipeline_mode<synchronous>, transform_indices = @transform_0, window_bounds = array<i64: 16, 32>}, {pipeline_mode = #tpu.pipeline_mode<synchronous>, transform_indices = @transform_1, window_bounds = array<i64: 2, 32, 128>}, {pipeline_mode = #tpu.pipeline_mode<synchronous>, transform_indices = @transform_2, window_bounds = array<i64: 2, 128, 32>}, {pipeline_mode = #tpu.pipeline_mode<synchronous>, transform_indices = @transform_3, window_bounds = array<i64: 32, 64>}, {pipeline_mode = #tpu.pipeline_mode<synchronous>, transform_indices = @transform_4, window_bounds = array<i64: 64, 32>}, {pipeline_mode = #tpu.pipeline_mode<synchronous>, transform_indices = @transform_5, window_bounds = array<i64: 32, 64>}, {pipeline_mode = #tpu.pipeline_mode<synchronous>, transform_indices = @transform_6, window_bounds = array<i64: 64, 32>}, {pipeline_mode = #tpu.pipeline_mode<synchronous>, transform_indices = @transform_7, window_bounds = array<i64: 32, 128>}, {pipeline_mode = #tpu.pipeline_mode<synchronous>, transform_indices = @transform_8, window_bounds = array<i64: 2, 3, 64, 128>}, {pipeline_mode = #tpu.pipeline_mode<synchronous>, transform_indices = @transform_9, window_bounds = array<i64: 7, 128>}, {pipeline_mode = #tpu.pipeline_mode<synchronous>, transform_indices = @transform_10, window_bounds = array<i64: 16, 128>}, {pipeline_mode = #tpu.pipeline_mode<synchronous>, transform_indices = @transform_11, window_bounds = array<i64: 2, 8, 128>}]} {
    %c0 = arith.constant 0 : index
    %c0_0 = arith.constant 0 : index
    %0 = vector.load %arg1[%c0, %c0_0] : memref<16x32xf32, #tpu.memory_space<vmem>>, vector<16x32xf32>
    %cst = arith.constant 0.707106769 : f32
    %1 = vector.broadcast %cst : f32 to vector<16x32xf32>
    %2 = arith.mulf %0, %1 : vector<16x32xf32>
    %c0_1 = arith.constant 0 : index
    %c0_2 = arith.constant 0 : index
    %3 = vector.load %arg10[%c0_1, %c0_2] : memref<7x128xf32, #tpu.memory_space<vmem>>, vector<1x64xf32>
    %c1 = arith.constant 1 : index
    %c0_3 = arith.constant 0 : index
    %4 = vector.load %arg10[%c1, %c0_3] : memref<7x128xf32, #tpu.memory_space<vmem>>, vector<1x32xf32>
    %c2 = arith.constant 2 : index
    %c0_4 = arith.constant 0 : index
    %5 = vector.load %arg10[%c2, %c0_4] : memref<7x128xf32, #tpu.memory_space<vmem>>, vector<1x64xf32>
    %c3 = arith.constant 3 : index
    %c0_5 = arith.constant 0 : index
    %6 = vector.load %arg10[%c3, %c0_5] : memref<7x128xf32, #tpu.memory_space<vmem>>, vector<1x32xf32>
    %c4 = arith.constant 4 : index
    %c0_6 = arith.constant 0 : index
    %7 = vector.load %arg10[%c4, %c0_6] : memref<7x128xf32, #tpu.memory_space<vmem>>, vector<1x128xf32>
    %c0_7 = arith.constant 0 : index
    %c0_8 = arith.constant 0 : index
    %c0_9 = arith.constant 0 : index
    %8 = vector.load %arg2[%c0_7, %c0_8, %c0_9] : memref<2x32x128xf32, #tpu.memory_space<vmem>>, vector<2x32x128xf32>
    %c0_10 = arith.constant 0 : index
    %c0_11 = arith.constant 0 : index
    %c0_12 = arith.constant 0 : index
    %9 = vector.load %arg3[%c0_10, %c0_11, %c0_12] : memref<2x128x32xf32, #tpu.memory_space<vmem>>, vector<2x128x32xf32>
    %10 = tpu.iota {dimensions = array<i32: 2>} : vector<1x1x128xi32>
    %c10_i32 = arith.constant 10 : i32
    %11 = vector.broadcast %c10_i32 : i32 to vector<1x1x128xi32>
    %12 = arith.cmpi slt, %10, %11 : vector<1x1x128xi32>
    %13 = tpu.iota {dimensions = array<i32: 1>} : vector<2x8x1xi32>
    %14 = vector.shape_cast %13 : vector<2x8x1xi32> to vector<16x1xi32>
    %c1_i32 = arith.constant 1 : i32
    %15 = vector.broadcast %c1_i32 : i32 to vector<16x1xi32>
    %16 = arith.cmpi slt, %14, %15 : vector<16x1xi32>
    %c2_i32 = arith.constant 2 : i32
    %17 = vector.broadcast %c2_i32 : i32 to vector<16x1xi32>
    %18 = arith.cmpi slt, %14, %17 : vector<16x1xi32>
    %cst_13 = arith.constant 1.000000e+00 : f32
    %19 = vector.broadcast %cst_13 : f32 to vector<1x64xf32>
    %cst_14 = arith.constant 1.000000e+00 : f32
    %20 = vector.broadcast %cst_14 : f32 to vector<2x64xf32>
    %c0_15 = arith.constant 0 : index
    %c0_16 = arith.constant 0 : index
    %21 = vector.load %arg4[%c0_15, %c0_16] : memref<32x64xf32, #tpu.memory_space<vmem>>, vector<32x64xf32>
    %cst_17 = arith.constant dense<0.000000e+00> : vector<16x64xf32>
    %22 = tpu.matmul %0, %21, %cst_17 {dimension_numbers = #tpu.dot_dimension_numbers<[1], [0], [0], [1], [0, 0, 1, 1], [], []>} : vector<16x32xf32>, vector<32x64xf32>, vector<16x64xf32> -> vector<16x64xf32>
    %23 = vector.broadcast %3 : vector<1x64xf32> to vector<16x64xf32>
    %24 = arith.addf %22, %23 : vector<16x64xf32>
    %c0_18 = arith.constant 0 : index
    %c2_19 = arith.constant 2 : index
    %c0_20 = arith.constant 0 : index
    %c0_21 = arith.constant 0 : index
    %25 = vector.load %arg9[%c0_18, %c2_19, %c0_20, %c0_21] : memref<2x3x64x128xf32, #tpu.memory_space<vmem>>, vector<1x1x64x128xf32>
    %26 = vector.shape_cast %25 : vector<1x1x64x128xf32> to vector<64x128xf32>
    %cst_22 = arith.constant dense<0.000000e+00> : vector<16x128xf32>
    %27 = tpu.matmul %24, %26, %cst_22 {dimension_numbers = #tpu.dot_dimension_numbers<[1], [0], [0], [1], [0, 0, 1, 1], [], []>} : vector<16x64xf32>, vector<64x128xf32>, vector<16x128xf32> -> vector<16x128xf32>
    %c5 = arith.constant 5 : index
    %c0_23 = arith.constant 0 : index
    %28 = vector.load %arg10[%c5, %c0_23] : memref<7x128xf32, #tpu.memory_space<vmem>>, vector<1x128xf32>
    %29 = vector.broadcast %28 : vector<1x128xf32> to vector<16x128xf32>
    %30 = arith.addf %27, %29 : vector<16x128xf32>
    %31 = vector.extract_strided_slice %24 {offsets = [0, 0], sizes = [14, 64], strides = [1, 1]} : vector<16x64xf32> to vector<14x64xf32>
    %32 = tpu.concatenate %20, %31 in 0 : vector<2x64xf32>, vector<14x64xf32> -> vector<16x64xf32>
    %cst_24 = arith.constant 1.000000e+00 : f32
    %33 = vector.shape_cast %18 : vector<16x1xi1> to vector<16x1xi1>
    %34 = vector.broadcast %33 : vector<16x1xi1> to vector<16x64xi1>
    %35 = vector.broadcast %cst_24 : f32 to vector<16x64xf32>
    %36 = arith.select %34, %35, %32 : vector<16x64xi1>, vector<16x64xf32>
    %c0_25 = arith.constant 0 : index
    %c0_26 = arith.constant 0 : index
    %c0_27 = arith.constant 0 : index
    %c0_28 = arith.constant 0 : index
    %37 = vector.load %arg9[%c0_25, %c0_26, %c0_27, %c0_28] : memref<2x3x64x128xf32, #tpu.memory_space<vmem>>, vector<1x1x64x128xf32>
    %38 = vector.shape_cast %37 : vector<1x1x64x128xf32> to vector<64x128xf32>
    %cst_29 = arith.constant dense<0.000000e+00> : vector<16x128xf32>
    %39 = tpu.matmul %36, %38, %cst_29 {dimension_numbers = #tpu.dot_dimension_numbers<[1], [0], [0], [1], [0, 0, 1, 1], [], []>} : vector<16x64xf32>, vector<64x128xf32>, vector<16x128xf32> -> vector<16x128xf32>
    %40 = arith.addf %30, %39 : vector<16x128xf32>
    %41 = vector.extract_strided_slice %24 {offsets = [0, 0], sizes = [15, 64], strides = [1, 1]} : vector<16x64xf32> to vector<15x64xf32>
    %42 = tpu.concatenate %19, %41 in 0 : vector<1x64xf32>, vector<15x64xf32> -> vector<16x64xf32>
    %cst_30 = arith.constant 1.000000e+00 : f32
    %43 = vector.shape_cast %16 : vector<16x1xi1> to vector<16x1xi1>
    %44 = vector.broadcast %43 : vector<16x1xi1> to vector<16x64xi1>
    %45 = vector.broadcast %cst_30 : f32 to vector<16x64xf32>
    %46 = arith.select %44, %45, %42 : vector<16x64xi1>, vector<16x64xf32>
    %c0_31 = arith.constant 0 : index
    %c1_32 = arith.constant 1 : index
    %c0_33 = arith.constant 0 : index
    %c0_34 = arith.constant 0 : index
    %47 = vector.load %arg9[%c0_31, %c1_32, %c0_33, %c0_34] : memref<2x3x64x128xf32, #tpu.memory_space<vmem>>, vector<1x1x64x128xf32>
    %48 = vector.shape_cast %47 : vector<1x1x64x128xf32> to vector<64x128xf32>
    %cst_35 = arith.constant dense<0.000000e+00> : vector<16x128xf32>
    %49 = tpu.matmul %46, %48, %cst_35 {dimension_numbers = #tpu.dot_dimension_numbers<[1], [0], [0], [1], [0, 0, 1, 1], [], []>} : vector<16x64xf32>, vector<64x128xf32>, vector<16x128xf32> -> vector<16x128xf32>
    %50 = arith.addf %40, %49 : vector<16x128xf32>
    %51 = vector.extract_strided_slice %50 {offsets = [0, 0], sizes = [16, 64], strides = [1, 1]} : vector<16x128xf32> to vector<16x64xf32>
    %52 = vector.extract_strided_slice %50 {offsets = [0, 64], sizes = [16, 64], strides = [1, 1]} : vector<16x128xf32> to vector<16x64xf32>
    %53 = arith.negf %52 : vector<16x64xf32>
    %54 = math.exp %53 : vector<16x64xf32>
    %cst_36 = arith.constant 1.000000e+00 : f32
    %55 = vector.broadcast %cst_36 : f32 to vector<16x64xf32>
    %56 = arith.addf %55, %54 : vector<16x64xf32>
    %57 = arith.divf %55, %56 : vector<16x64xf32>
    %58 = arith.mulf %51, %57 : vector<16x64xf32>
    %c0_37 = arith.constant 0 : index
    %c0_38 = arith.constant 0 : index
    %59 = vector.load %arg5[%c0_37, %c0_38] : memref<64x32xf32, #tpu.memory_space<vmem>>, vector<64x32xf32>
    %cst_39 = arith.constant dense<0.000000e+00> : vector<16x32xf32>
    %60 = tpu.matmul %58, %59, %cst_39 {dimension_numbers = #tpu.dot_dimension_numbers<[1], [0], [0], [1], [0, 0, 1, 1], [], []>} : vector<16x64xf32>, vector<64x32xf32>, vector<16x32xf32> -> vector<16x32xf32>
    %61 = vector.broadcast %4 : vector<1x32xf32> to vector<16x32xf32>
    %62 = arith.addf %60, %61 : vector<16x32xf32>
    %63 = arith.addf %62, %2 : vector<16x32xf32>
    %64 = vector.shape_cast %63 : vector<16x32xf32> to vector<2x8x32xf32>
    "tpu.trace_start"() <{level = 10 : i32, message = "bte,bes->bts"}> : () -> ()
    %cst_40 = arith.constant dense<0.000000e+00> : vector<2x8x128xf32>
    %65 = tpu.matmul %64, %8, %cst_40 {dimension_numbers = #tpu.dot_dimension_numbers<[2], [1], [1], [2], [0, 0, 0, 1, 1, 2], [0], [0]>} : vector<2x8x32xf32>, vector<2x32x128xf32>, vector<2x8x128xf32> -> vector<2x8x128xf32>
    %cst_41 = arith.constant -1.000000e+30 : f32
    "tpu.trace_stop"() : () -> ()
    %66 = vector.shape_cast %12 : vector<1x1x128xi1> to vector<1x1x128xi1>
    %67 = vector.broadcast %66 : vector<1x1x128xi1> to vector<2x8x128xi1>
    %68 = vector.broadcast %cst_41 : f32 to vector<2x8x128xf32>
    %69 = arith.select %67, %65, %68 : vector<2x8x128xi1>, vector<2x8x128xf32>
    %cst_42 = arith.constant dense<0xFF800000> : vector<2x8xf32>
    %70 = vector.multi_reduction <maximumf>, %69, %cst_42 [2] : vector<2x8x128xf32> to vector<2x8xf32>
    %71 = vector.shape_cast %70 : vector<2x8xf32> to vector<2x8x1xf32>
    %72 = vector.broadcast %71 : vector<2x8x1xf32> to vector<2x8x128xf32>
    %73 = arith.subf %69, %72 : vector<2x8x128xf32>
    %74 = math.exp %73 : vector<2x8x128xf32>
    %cst_43 = arith.constant dense<0.000000e+00> : vector<2x8xf32>
    %75 = vector.multi_reduction <add>, %74, %cst_43 [2] : vector<2x8x128xf32> to vector<2x8xf32>
    %76 = vector.shape_cast %75 : vector<2x8xf32> to vector<2x8x1xf32>
    %77 = vector.broadcast %76 : vector<2x8x1xf32> to vector<2x8x128xf32>
    %78 = arith.divf %74, %77 : vector<2x8x128xf32>
    "tpu.trace_start"() <{level = 10 : i32, message = "bts,bse->bte"}> : () -> ()
    %cst_44 = arith.constant dense<0.000000e+00> : vector<2x8x32xf32>
    %79 = tpu.matmul %78, %9, %cst_44 {dimension_numbers = #tpu.dot_dimension_numbers<[2], [1], [1], [2], [0, 0, 0, 1, 1, 2], [0], [0]>} : vector<2x8x128xf32>, vector<2x128x32xf32>, vector<2x8x32xf32> -> vector<2x8x32xf32>
    "tpu.trace_stop"() : () -> ()
    %80 = vector.shape_cast %79 : vector<2x8x32xf32> to vector<16x32xf32>
    %c0_45 = arith.constant 0 : index
    %c0_46 = arith.constant 0 : index
    %81 = vector.load %arg6[%c0_45, %c0_46] : memref<32x64xf32, #tpu.memory_space<vmem>>, vector<32x64xf32>
    %cst_47 = arith.constant dense<0.000000e+00> : vector<16x64xf32>
    %82 = tpu.matmul %80, %81, %cst_47 {dimension_numbers = #tpu.dot_dimension_numbers<[1], [0], [0], [1], [0, 0, 1, 1], [], []>} : vector<16x32xf32>, vector<32x64xf32>, vector<16x64xf32> -> vector<16x64xf32>
    %83 = vector.broadcast %5 : vector<1x64xf32> to vector<16x64xf32>
    %84 = arith.addf %82, %83 : vector<16x64xf32>
    %85 = arith.addf %58, %84 : vector<16x64xf32>
    %cst_48 = arith.constant 0.707106769 : f32
    %86 = vector.broadcast %cst_48 : f32 to vector<16x64xf32>
    %87 = arith.mulf %85, %86 : vector<16x64xf32>
    %88 = arith.addf %87, %24 : vector<16x64xf32>
    %cst_49 = arith.constant 0.707106769 : f32
    %89 = vector.broadcast %cst_49 : f32 to vector<16x64xf32>
    %90 = arith.mulf %88, %89 : vector<16x64xf32>
    %c1_50 = arith.constant 1 : index
    %c2_51 = arith.constant 2 : index
    %c0_52 = arith.constant 0 : index
    %c0_53 = arith.constant 0 : index
    %91 = vector.load %arg9[%c1_50, %c2_51, %c0_52, %c0_53] : memref<2x3x64x128xf32, #tpu.memory_space<vmem>>, vector<1x1x64x128xf32>
    %92 = vector.shape_cast %91 : vector<1x1x64x128xf32> to vector<64x128xf32>
    %cst_54 = arith.constant dense<0.000000e+00> : vector<16x128xf32>
    %93 = tpu.matmul %90, %92, %cst_54 {dimension_numbers = #tpu.dot_dimension_numbers<[1], [0], [0], [1], [0, 0, 1, 1], [], []>} : vector<16x64xf32>, vector<64x128xf32>, vector<16x128xf32> -> vector<16x128xf32>
    %c6 = arith.constant 6 : index
    %c0_55 = arith.constant 0 : index
    %94 = vector.load %arg10[%c6, %c0_55] : memref<7x128xf32, #tpu.memory_space<vmem>>, vector<1x128xf32>
    %95 = vector.broadcast %94 : vector<1x128xf32> to vector<16x128xf32>
    %96 = arith.addf %93, %95 : vector<16x128xf32>
    %97 = vector.extract_strided_slice %90 {offsets = [0, 0], sizes = [14, 64], strides = [1, 1]} : vector<16x64xf32> to vector<14x64xf32>
    %98 = tpu.concatenate %20, %97 in 0 : vector<2x64xf32>, vector<14x64xf32> -> vector<16x64xf32>
    %cst_56 = arith.constant 1.000000e+00 : f32
    %99 = vector.shape_cast %18 : vector<16x1xi1> to vector<16x1xi1>
    %100 = vector.broadcast %99 : vector<16x1xi1> to vector<16x64xi1>
    %101 = vector.broadcast %cst_56 : f32 to vector<16x64xf32>
    %102 = arith.select %100, %101, %98 : vector<16x64xi1>, vector<16x64xf32>
    %c1_57 = arith.constant 1 : index
    %c0_58 = arith.constant 0 : index
    %c0_59 = arith.constant 0 : index
    %c0_60 = arith.constant 0 : index
    %103 = vector.load %arg9[%c1_57, %c0_58, %c0_59, %c0_60] : memref<2x3x64x128xf32, #tpu.memory_space<vmem>>, vector<1x1x64x128xf32>
    %104 = vector.shape_cast %103 : vector<1x1x64x128xf32> to vector<64x128xf32>
    %cst_61 = arith.constant dense<0.000000e+00> : vector<16x128xf32>
    %105 = tpu.matmul %102, %104, %cst_61 {dimension_numbers = #tpu.dot_dimension_numbers<[1], [0], [0], [1], [0, 0, 1, 1], [], []>} : vector<16x64xf32>, vector<64x128xf32>, vector<16x128xf32> -> vector<16x128xf32>
    %106 = arith.addf %96, %105 : vector<16x128xf32>
    %107 = vector.extract_strided_slice %90 {offsets = [0, 0], sizes = [15, 64], strides = [1, 1]} : vector<16x64xf32> to vector<15x64xf32>
    %108 = tpu.concatenate %19, %107 in 0 : vector<1x64xf32>, vector<15x64xf32> -> vector<16x64xf32>
    %cst_62 = arith.constant 1.000000e+00 : f32
    %109 = vector.shape_cast %16 : vector<16x1xi1> to vector<16x1xi1>
    %110 = vector.broadcast %109 : vector<16x1xi1> to vector<16x64xi1>
    %111 = vector.broadcast %cst_62 : f32 to vector<16x64xf32>
    %112 = arith.select %110, %111, %108 : vector<16x64xi1>, vector<16x64xf32>
    %c1_63 = arith.constant 1 : index
    %c1_64 = arith.constant 1 : index
    %c0_65 = arith.constant 0 : index
    %c0_66 = arith.constant 0 : index
    %113 = vector.load %arg9[%c1_63, %c1_64, %c0_65, %c0_66] : memref<2x3x64x128xf32, #tpu.memory_space<vmem>>, vector<1x1x64x128xf32>
    %114 = vector.shape_cast %113 : vector<1x1x64x128xf32> to vector<64x128xf32>
    %cst_67 = arith.constant dense<0.000000e+00> : vector<16x128xf32>
    %115 = tpu.matmul %112, %114, %cst_67 {dimension_numbers = #tpu.dot_dimension_numbers<[1], [0], [0], [1], [0, 0, 1, 1], [], []>} : vector<16x64xf32>, vector<64x128xf32>, vector<16x128xf32> -> vector<16x128xf32>
    %116 = arith.addf %106, %115 : vector<16x128xf32>
    %117 = vector.extract_strided_slice %116 {offsets = [0, 0], sizes = [16, 64], strides = [1, 1]} : vector<16x128xf32> to vector<16x64xf32>
    %118 = vector.extract_strided_slice %116 {offsets = [0, 64], sizes = [16, 64], strides = [1, 1]} : vector<16x128xf32> to vector<16x64xf32>
    %119 = arith.negf %118 : vector<16x64xf32>
    %120 = math.exp %119 : vector<16x64xf32>
    %cst_68 = arith.constant 1.000000e+00 : f32
    %121 = vector.broadcast %cst_68 : f32 to vector<16x64xf32>
    %122 = arith.addf %121, %120 : vector<16x64xf32>
    %123 = arith.divf %121, %122 : vector<16x64xf32>
    %124 = arith.mulf %117, %123 : vector<16x64xf32>
    %c0_69 = arith.constant 0 : index
    %c0_70 = arith.constant 0 : index
    %125 = vector.load %arg5[%c0_69, %c0_70] : memref<64x32xf32, #tpu.memory_space<vmem>>, vector<64x32xf32>
    %cst_71 = arith.constant dense<0.000000e+00> : vector<16x32xf32>
    %126 = tpu.matmul %124, %125, %cst_71 {dimension_numbers = #tpu.dot_dimension_numbers<[1], [0], [0], [1], [0, 0, 1, 1], [], []>} : vector<16x64xf32>, vector<64x32xf32>, vector<16x32xf32> -> vector<16x32xf32>
    %127 = vector.broadcast %4 : vector<1x32xf32> to vector<16x32xf32>
    %128 = arith.addf %126, %127 : vector<16x32xf32>
    %129 = arith.addf %128, %2 : vector<16x32xf32>
    %130 = vector.shape_cast %129 : vector<16x32xf32> to vector<2x8x32xf32>
    "tpu.trace_start"() <{level = 10 : i32, message = "bte,bes->bts"}> : () -> ()
    %cst_72 = arith.constant dense<0.000000e+00> : vector<2x8x128xf32>
    %131 = tpu.matmul %130, %8, %cst_72 {dimension_numbers = #tpu.dot_dimension_numbers<[2], [1], [1], [2], [0, 0, 0, 1, 1, 2], [0], [0]>} : vector<2x8x32xf32>, vector<2x32x128xf32>, vector<2x8x128xf32> -> vector<2x8x128xf32>
    %cst_73 = arith.constant -1.000000e+30 : f32
    "tpu.trace_stop"() : () -> ()
    %132 = vector.shape_cast %12 : vector<1x1x128xi1> to vector<1x1x128xi1>
    %133 = vector.broadcast %132 : vector<1x1x128xi1> to vector<2x8x128xi1>
    %134 = vector.broadcast %cst_73 : f32 to vector<2x8x128xf32>
    %135 = arith.select %133, %131, %134 : vector<2x8x128xi1>, vector<2x8x128xf32>
    %cst_74 = arith.constant dense<0xFF800000> : vector<2x8xf32>
    %136 = vector.multi_reduction <maximumf>, %135, %cst_74 [2] : vector<2x8x128xf32> to vector<2x8xf32>
    %137 = vector.shape_cast %136 : vector<2x8xf32> to vector<2x8x1xf32>
    %138 = vector.broadcast %137 : vector<2x8x1xf32> to vector<2x8x128xf32>
    %139 = arith.subf %135, %138 : vector<2x8x128xf32>
    %140 = math.exp %139 : vector<2x8x128xf32>
    %cst_75 = arith.constant dense<0.000000e+00> : vector<2x8xf32>
    %141 = vector.multi_reduction <add>, %140, %cst_75 [2] : vector<2x8x128xf32> to vector<2x8xf32>
    %142 = vector.shape_cast %141 : vector<2x8xf32> to vector<2x8x1xf32>
    %143 = vector.broadcast %142 : vector<2x8x1xf32> to vector<2x8x128xf32>
    %144 = arith.divf %140, %143 : vector<2x8x128xf32>
    "tpu.trace_start"() <{level = 10 : i32, message = "bts,bse->bte"}> : () -> ()
    %cst_76 = arith.constant dense<0.000000e+00> : vector<2x8x32xf32>
    %145 = tpu.matmul %144, %9, %cst_76 {dimension_numbers = #tpu.dot_dimension_numbers<[2], [1], [1], [2], [0, 0, 0, 1, 1, 2], [0], [0]>} : vector<2x8x128xf32>, vector<2x128x32xf32>, vector<2x8x32xf32> -> vector<2x8x32xf32>
    "tpu.trace_stop"() : () -> ()
    %146 = vector.shape_cast %145 : vector<2x8x32xf32> to vector<16x32xf32>
    %c0_77 = arith.constant 0 : index
    %c0_78 = arith.constant 0 : index
    %147 = vector.load %arg6[%c0_77, %c0_78] : memref<32x64xf32, #tpu.memory_space<vmem>>, vector<32x64xf32>
    %cst_79 = arith.constant dense<0.000000e+00> : vector<16x64xf32>
    %148 = tpu.matmul %146, %147, %cst_79 {dimension_numbers = #tpu.dot_dimension_numbers<[1], [0], [0], [1], [0, 0, 1, 1], [], []>} : vector<16x32xf32>, vector<32x64xf32>, vector<16x64xf32> -> vector<16x64xf32>
    %149 = vector.broadcast %5 : vector<1x64xf32> to vector<16x64xf32>
    %150 = arith.addf %148, %149 : vector<16x64xf32>
    %151 = arith.addf %124, %150 : vector<16x64xf32>
    %cst_80 = arith.constant 0.707106769 : f32
    %152 = vector.broadcast %cst_80 : f32 to vector<16x64xf32>
    %153 = arith.mulf %151, %152 : vector<16x64xf32>
    %154 = arith.addf %153, %90 : vector<16x64xf32>
    %cst_81 = arith.constant 0.707106769 : f32
    %155 = vector.broadcast %cst_81 : f32 to vector<16x64xf32>
    %156 = arith.mulf %154, %155 : vector<16x64xf32>
    %c0_82 = arith.constant 0 : index
    %c0_83 = arith.constant 0 : index
    %157 = vector.load %arg7[%c0_82, %c0_83] : memref<64x32xf32, #tpu.memory_space<vmem>>, vector<64x32xf32>
    %cst_84 = arith.constant dense<0.000000e+00> : vector<16x32xf32>
    %158 = tpu.matmul %156, %157, %cst_84 {dimension_numbers = #tpu.dot_dimension_numbers<[1], [0], [0], [1], [0, 0, 1, 1], [], []>} : vector<16x64xf32>, vector<64x32xf32>, vector<16x32xf32> -> vector<16x32xf32>
    %159 = vector.broadcast %6 : vector<1x32xf32> to vector<16x32xf32>
    %160 = arith.addf %158, %159 : vector<16x32xf32>
    %c0_85 = arith.constant 0 : index
    %c0_86 = arith.constant 0 : index
    %161 = vector.load %arg8[%c0_85, %c0_86] : memref<32x128xf32, #tpu.memory_space<vmem>>, vector<32x128xf32>
    %cst_87 = arith.constant dense<0.000000e+00> : vector<16x128xf32>
    %162 = tpu.matmul %160, %161, %cst_87 {dimension_numbers = #tpu.dot_dimension_numbers<[1], [0], [0], [1], [0, 0, 1, 1], [], []>} : vector<16x32xf32>, vector<32x128xf32>, vector<16x128xf32> -> vector<16x128xf32>
    %163 = vector.broadcast %7 : vector<1x128xf32> to vector<16x128xf32>
    %164 = arith.addf %162, %163 : vector<16x128xf32>
    %c0_88 = arith.constant 0 : index
    %c0_89 = arith.constant 0 : index
    %165 = vector.load %arg11[%c0_88, %c0_89] : memref<16x128xf32, #tpu.memory_space<vmem>>, vector<16x128xf32>
    tpu.vector_store %arg11[%c0_88, %c0_89], %164 {strides = array<i32>} : memref<16x128xf32, #tpu.memory_space<vmem>>, vector<16x128xf32>,
    %c0_90 = arith.constant 0 : index
    %c0_91 = arith.constant 0 : index
    %c0_92 = arith.constant 0 : index
    %166 = vector.load %arg12[%c0_90, %c0_91, %c0_92] : memref<2x8x128xf32, #tpu.memory_space<vmem>>, vector<2x8x128xf32>
    tpu.vector_store %arg12[%c0_90, %c0_91, %c0_92], %144 {strides = array<i32>} : memref<2x8x128xf32, #tpu.memory_space<vmem>>, vector<2x8x128xf32>,
    return
  }
  func.func @transform_0(%arg0: i32) -> (i32, i32) {
    %c0_i32 = arith.constant 0 : i32
    %c0_i32_0 = arith.constant 0 : i32
    %c0_i32_1 = arith.constant 0 : i32
    return %c0_i32, %c0_i32_0 : i32, i32
  }
  func.func @transform_1(%arg0: i32) -> (i32, i32, i32) {
    %c0_i32 = arith.constant 0 : i32
    %c0_i32_0 = arith.constant 0 : i32
    %c0_i32_1 = arith.constant 0 : i32
    %c0_i32_2 = arith.constant 0 : i32
    return %c0_i32, %c0_i32_0, %c0_i32_1 : i32, i32, i32
  }
  func.func @transform_2(%arg0: i32) -> (i32, i32, i32) {
    %c0_i32 = arith.constant 0 : i32
    %c0_i32_0 = arith.constant 0 : i32
    %c0_i32_1 = arith.constant 0 : i32
    %c0_i32_2 = arith.constant 0 : i32
    return %c0_i32, %c0_i32_0, %c0_i32_1 : i32, i32, i32
  }
  func.func @transform_3(%arg0: i32) -> (i32, i32) {
    %c0_i32 = arith.constant 0 : i32
    %c0_i32_0 = arith.constant 0 : i32
    %c0_i32_1 = arith.constant 0 : i32
    return %c0_i32, %c0_i32_0 : i32, i32
  }
  func.func @transform_4(%arg0: i32) -> (i32, i32) {
    %c0_i32 = arith.constant 0 : i32
    %c0_i32_0 = arith.constant 0 : i32
    %c0_i32_1 = arith.constant 0 : i32
    return %c0_i32, %c0_i32_0 : i32, i32
  }
  func.func @transform_5(%arg0: i32) -> (i32, i32) {
    %c0_i32 = arith.constant 0 : i32
    %c0_i32_0 = arith.constant 0 : i32
    %c0_i32_1 = arith.constant 0 : i32
    return %c0_i32, %c0_i32_0 : i32, i32
  }
  func.func @transform_6(%arg0: i32) -> (i32, i32) {
    %c0_i32 = arith.constant 0 : i32
    %c0_i32_0 = arith.constant 0 : i32
    %c0_i32_1 = arith.constant 0 : i32
    return %c0_i32, %c0_i32_0 : i32, i32
  }
  func.func @transform_7(%arg0: i32) -> (i32, i32) {
    %c0_i32 = arith.constant 0 : i32
    %c0_i32_0 = arith.constant 0 : i32
    %c0_i32_1 = arith.constant 0 : i32
    return %c0_i32, %c0_i32_0 : i32, i32
  }
  func.func @transform_8(%arg0: i32) -> (i32, i32, i32, i32) {
    %c0_i32 = arith.constant 0 : i32
    %c0_i32_0 = arith.constant 0 : i32
    %c0_i32_1 = arith.constant 0 : i32
    %c0_i32_2 = arith.constant 0 : i32
    %c0_i32_3 = arith.constant 0 : i32
    return %c0_i32, %c0_i32_0, %c0_i32_1, %c0_i32_2 : i32, i32, i32, i32
  }
  func.func @transform_9(%arg0: i32) -> (i32, i32) {
    %c0_i32 = arith.constant 0 : i32
    %c0_i32_0 = arith.constant 0 : i32
    %c0_i32_1 = arith.constant 0 : i32
    return %c0_i32, %c0_i32_0 : i32, i32
  }
  func.func @transform_10(%arg0: i32) -> (i32, i32) {
    %c0_i32 = arith.constant 0 : i32
    %c0_i32_0 = arith.constant 0 : i32
    %c0_i32_1 = arith.constant 0 : i32
    return %c0_i32, %c0_i32_0 : i32, i32
  }
  func.func @transform_11(%arg0: i32) -> (i32, i32, i32) {
    %c0_i32 = arith.constant 0 : i32
    %c0_i32_0 = arith.constant 0 : i32
    %c0_i32_1 = arith.constant 0 : i32
    %c0_i32_2 = arith.constant 0 : i32
    return %c0_i32, %c0_i32_0, %c0_i32_1 : i32, i32, i32
  }
}

</mosaic_0001>

<bundles_post_ra>
// kernel: tpu_custom_call.1
= control target key start
LH: loop header
LB: loop body
LE: loop exit
PB: predicated region body
PF: predicated region fallthrough
CT: control target
= control target key end

     0   :  { %17 = vsyncpa [#allocation3], 0  ;;  %s2138_s0 = inlined_call_operand.hbm [shape: f32[16,32], index: 0, kind: input, shape index: {}]   ;;  %s2139_s1 = inlined_call_operand.vmem [shape: f32[2,32,128], index: 1, kind: input, shape index: {}]   ;;  %s2140_s2 = inlined_call_operand.vmem [shape: f32[2,128,32], index: 2, kind: input, shape index: {}]   ;;  %s2141_s3 = inlined_call_operand.vmem [shape: f32[32,64], index: 3, kind: input, shape index: {}]   ;;  %s2142_s4 = inlined_call_operand.vmem [shape: f32[64,32], index: 4, kind: input, shape index: {}]   ;;  %s2143_s5 = inlined_call_operand.vmem [shape: f32[32,64], index: 5, kind: input, shape index: {}]   ;;  %s2144_s6 = inlined_call_operand.vmem [shape: f32[64,32], index: 6, kind: input, shape index: {}]   ;;  %s2145_s7 = inlined_call_operand.hbm [shape: f32[32,128], index: 7, kind: input, shape index: {}]   ;;  %s2146_s8 = inlined_call_operand.vmem [shape: f32[2,3,64,128], index: 8, kind: input, shape index: {}]   ;;  %s2147_s9 = inlined_call_operand.hbm [shape: f32[7,128], index: 9, kind: input, shape index: {}]   ;;  %s2148_s10 = inlined_call_operand.hbm [shape: f32[16,128], index: 10, kind: output, shape index: {0}]   ;;  %s2149_s11 = inlined_call_operand.hbm [shape: f32[2,8,128], index: 11, kind: output, shape index: {1}]  }
   0x1   :  { %18 = vsyncpa [#allocation6], 0 }
   0x2   :  { %19 = vsyncpa [#allocation4], 0 }
   0x3   :  { %20 = vsyncpa [#allocation10], 0  ;;  %s50_s19 = sshll.u32 %s2145_s7, 4  ;;  %s1340_s20 = smov [#allocation5]   ;;  %s51_s19 = int_to_ptr.hbm [resolvable:$true] %s50_s19 }
   0x4   :  { %s52_s21 = sshll.u32 %s1340_s20, 4  ;;  %s25_s24 = sshll.u32 %s2138_s0, 4  ;;  %s53_s21 = int_to_ptr.vmem [resolvable:$true] %s52_s21  ;;  %s26_s24 = int_to_ptr.hbm [resolvable:$true] %s25_s24 }
   0x5   :  { %s1341_s25 = smov 128   ;;  %s1342_s26 = smov 8  }
   0x6   :  { %58 = dma.hbm_to_vmem [thread:$0]  %s51_s19, 512, %s53_s21, [#allocation6], %s1341_s25, %s1341_s25, %s1342_s26  }
   0x7   :  { %s1343_s27 = smov [#allocation2]   ;;  %s66_s7 = sshll.u32 %s2147_s9, 4  ;;  %s67_s7 = int_to_ptr.hbm [resolvable:$true] %s66_s7 }
   0x8   :  { %s27_s28 = sshll.u32 %s1343_s27, 4  ;;  %s1344_s0 = smov [#allocation7]   ;;  %s28_s28 = int_to_ptr.vmem [resolvable:$true] %s27_s28 }
   0x9   :  { %33 = dma.hbm_to_vmem [thread:$0]  %s26_s24, 256, %s28_s28, [#allocation3], %s1341_s25, %s1341_s25, %s1342_s26  }
   0xa   :  { %s68_s12 = sshll.u32 %s1344_s0, 4  ;;  %s69_s12 = int_to_ptr.vmem [resolvable:$true] %s68_s12 }
   0xb   :  { %71 = dma.hbm_to_vmem [thread:$0]  %s67_s7, 128, %s69_s12, [#allocation6]  }
   0xc   :  { %1332 = dma.done.wait [#allocation3], 256  }
   0xd   :  { %1333 = vsyncadd [#allocation3], 4294967040 }
   0xe   :  { %1334 = dma.done.wait [#allocation6], 640  }
   0xf   :  { %1335 = vsyncadd [#allocation6], 4294966656  ;;  %v143_v0 = vld [vmem:[%s2141_s3 + $0x18] sm:$0xff]  ;;  %v142_v1 = vld [vmem:[%s2141_s3 + $0x10] sm:$0xff]  ;;  %vm145_vm0 = vcmask 261120   ;;  %v133_v30 = vlaneseq  ;;  %vm186_vm1 = vcmask 523264  }
  0x10   :  { %164 = vmatpush.msra.mxu1 %v143_v0  ;;  %v141_v2 = vld [vmem:[%s2141_s3 + $0x8] sm:$0xff]  ;;  %v234_v3 = vld [vmem:[%s2146_s8 + $0x38] sm:$0xff]  ;;  %v140_v5 = vld [vmem:[%s2141_s3] sm:$0xff]  ;;  %vm216_vm2 = vcmask 1041408   ;;  %vm266_vm3 = vcmask 1040384   ;;  %s1345_s19 = smov 64  }
  0x11   :  { %v1112_v4 = vld [vmem:[%s2146_s8 + $0x78] sm:$0xff]  ;;  %249 = vmatpush.msra.mxu2 %v234_v3  ;;  %v233_v6 = vld [vmem:[%s2146_s8 + $0x30] sm:$0xff]  ;;  %v1447_v8 = vld [vmem:[#allocation2] sm:$0xff]  ;;  %v1516_v32 = vshrl.u32 %v133_v30, 7  ;;  %s1072_s9 = sshll.u32 %s2149_s11, 4  ;;  %s1059_s18 = sshll.u32 %s2148_s10, 4  ;;  %s1073_s9 = int_to_ptr.hbm [resolvable:$true] %s1072_s9  ;;  %s1060_s18 = int_to_ptr.hbm [resolvable:$true] %s1059_s18 }
  0x12   :  { %165 = vmatpush.msra.mxu1 %v142_v1  ;;  %300 = vmatpush.msra.mxu3 %v1112_v4  ;;  %v1111_v7 = vld [vmem:[%s2146_s8 + $0x70] sm:$0xff]  ;;  %v1100_v9 = vld [vmem:[%s2146_s8 + $0xb8] sm:$0xff]  ;;  %v232_v10 = vld [vmem:[%s2146_s8 + $0x28] sm:$0xff] }
  0x13   :  { %v1099_v11 = vld [vmem:[%s2146_s8 + $0xb0] sm:$0xff]  ;;  %250 = vmatpush.msra.mxu2 %v233_v6  ;;  %v1110_v12 = vld [vmem:[%s2146_s8 + $0x68] sm:$0xff]  ;;  %v231_v13 = vld [vmem:[%s2146_s8 + $0x20] sm:$0xff]  ;;  %vm139_vm4 = vcmp.lt.s32.totalorder %v1516_v32, 2  ;;  %vm138_vm5 = vcmp.lt.s32.totalorder %v1516_v32, 1 }
  0x14   :  { %166 = vmatpush.msra.mxu1 %v141_v2  ;;  %301 = vmatpush.msra.mxu3 %v1111_v7  ;;  %v1109_v14 = vld [vmem:[%s2146_s8 + $0x60] sm:$0xff]  ;;  %v1098_v15 = vld [vmem:[%s2146_s8 + $0xa8] sm:$0xff]  ;;  %v1096_v18 = vld [vmem:[%s2146_s8 + $0x98] sm:$0xff] }
  0x15   :  { %251 = vmatpush.msra.mxu2 %v232_v10  ;;  %v1097_v16 = vld [vmem:[%s2146_s8 + $0xa0] sm:$0xff]  ;;  %v1475_v17 = vld [vmem:[#allocation2 + $0x8] sm:$0xff]  ;;  %v1095_v19 = vld [vmem:[%s2146_s8 + $0x90] sm:$0xff] }
  0x16   :  { %167 = vmatpush.msra.mxu1 %v140_v5  ;;  %302 = vmatpush.msra.mxu3 %v1110_v12  ;;  %v1094_v20 = vld [vmem:[%s2146_s8 + $0x88] sm:$0xff]  ;;  %v230_v21 = vld [vmem:[%s2146_s8 + $0x18] sm:$0xff]  ;;  %v1093_v23 = vld [vmem:[%s2146_s8 + $0x80] sm:$0xff] }
  0x17   :  { %1091 = vmatmul.msk.f32.vlgmr.msra.gmra.mxu1 %vm145_vm0, %v1447_v8  ;;  %252 = vmatpush.msra.mxu2 %v231_v13  ;;  %v1108_v22 = vld [vmem:[%s2146_s8 + $0x58] sm:$0xff]  ;;  %v229_v24 = vld [vmem:[%s2146_s8 + $0x10] sm:$0xff]  ;;  %v228_v26 = vld [vmem:[%s2146_s8 + $0x8] sm:$0xff] }
  0x18   :  { %201 = vmatpush.msrb.mxu1 %v1100_v9  ;;  %303 = vmatpush.msra.mxu3 %v1109_v14  ;;  %v1107_v25 = vld [vmem:[%s2146_s8 + $0x50] sm:$0xff]  ;;  %v1106_v27 = vld [vmem:[%s2146_s8 + $0x48] sm:$0xff]  ;;  %v227_v28 = vld [vmem:[%s2146_s8] sm:$0xff] }
  0x19   :  { %253 = vmatpush.msra.mxu2 %v230_v21  ;;  %v1105_v29 = vld [vmem:[%s2146_s8 + $0x40] sm:$0xff]  ;;  %v1173_v31 = vld [vmem:[#allocation7] ss:$0 sm:$0xff]  ;;  %v1174_v50 = vld [vmem:[#allocation7 + $0x5] ss:$0 sm:$0xff] }
  0x1a   :  { %202 = vmatpush.msrb.mxu1 %v1099_v11  ;;  %304 = vmatpush.msra.mxu3 %v1108_v22  ;;  %v1554_v61 = vld [vmem:[%s2142_s4 + $0x38] sm:$0xff]  ;;  %v1559_v62 = vld [vmem:[%s2142_s4 + $0x30] sm:$0xff]  ;;  %v1567_v1 = vld [vmem:[%s2142_s4 + $0x28] sm:$0xff] }
  0x1b   :  { %254 = vmatpush.msra.mxu2 %v229_v24  ;;  %388 = vmatpush.msra.mxu0 %v1554_v61  ;;  %v1574_v4 = vld [vmem:[%s2142_s4 + $0x20] sm:$0xff]  ;;  %v1580_v6 = vld [vmem:[%s2142_s4 + $0x18] sm:$0xff]  ;;  %v1586_v7 = vld [vmem:[%s2142_s4 + $0x10] sm:$0xff] }
  0x1c   :  { %203 = vmatpush.msrb.mxu1 %v1098_v15  ;;  %305 = vmatpush.msra.mxu3 %v1107_v25  ;;  %v1592_v9 = vld [vmem:[%s2142_s4 + $0x8] sm:$0xff] }
  0x1d   :  { %255 = vmatpush.msra.mxu2 %v228_v26  ;;  %389 = vmatpush.msra.mxu0 %v1559_v62 }
  0x1e   :  { %204 = vmatpush.msrb.mxu1 %v1097_v16  ;;  %306 = vmatpush.msra.mxu3 %v1106_v27 }
  0x1f   :  { %1092 = vmatmul.msk.f32.gmra.mxu1 %vm145_vm0, %v1475_v17  ;;  %256 = vmatpush.msra.mxu2 %v227_v28 }
  0x20   :  { %205 = vmatpush.msrb.mxu1 %v1096_v18  ;;  %307 = vmatpush.msra.mxu3 %v1105_v29 }
  0x21   :  { %390 = vmatpush.msra.mxu0 %v1567_v1 }
  0x22   :  { %206 = vmatpush.msrb.mxu1 %v1095_v19 }
  0x23   :  { %391 = vmatpush.msra.mxu0 %v1574_v4 }
  0x24   :  { %207 = vmatpush.msrb.mxu1 %v1094_v20 }
  0x25   :  { %392 = vmatpush.msra.mxu0 %v1580_v6 }
  0x26   :  { %208 = vmatpush.msrb.mxu1 %v1093_v23 }
  0x27   :  { %393 = vmatpush.msra.mxu0 %v1586_v7 }
  0x29   :  { %394 = vmatpush.msra.mxu0 %v1592_v9 }
  0x94   :  { %v169_v33 = vpop.f32.mrf.mxu1 }
  0x95   :  { %v1518_v34 = vadd.f32 %v1173_v31, %v169_v33 }
  0x97   :  { %1101 = vmatmul.msk.f32.vlgmr.msrb.gmra.mxu1 %vm186_vm1, %v1518_v34  ;;  %v217_v35 = vrot.slane %v1518_v34, 6  ;;  %v267_v36 = vrot.slane %v1518_v34, 7 }
  0x99   :  { %v222_v37 = vsel %vm216_vm2, 1.0, %v217_v35  ;;  %v272_v38 = vsel %vm266_vm3, 1.0, %v267_v36 }
  0x9a   :  { %v225_v39 = vsel %vm139_vm4, 1.0, %v222_v37  ;;  %v275_v40 = vsel %vm138_vm5, 1.0, %v272_v38  ;;  %v1607_v37 = vld [vmem:[%s2139_s1 + $0x18] sm:$0xff]  ;;  %v1612_v38 = vld [vmem:[%s2139_s1 + $0x10] sm:$0xff] }
  0x9b   :  { %1103 = vmatmul.msk.f32.vlgmr.msra.gmra.mxu2 %vm186_vm1, %v225_v39  ;;  %1113 = vmatmul.msk.f32.vlgmr.msra.gmra.mxu3 %vm186_vm1, %v275_v40  ;;  %v1618_v39 = vld [vmem:[%s2139_s1 + $0x38] sm:$0xff]  ;;  %v1623_v40 = vld [vmem:[%s2139_s1 + $0x8] sm:$0xff] }
  0x9c   :  { %v172_v41 = vpop.f32.mrf.mxu1  ;;  %420 = vmatpush.msra.mxu1 %v1607_v37  ;;  %443 = vmatpush.msrb.mxu2 %v1618_v39 }
  0x9d   :  { %v1534_v42 = vadd.f32 %v1173_v31, %v172_v41 }
  0x9e   :  { %421 = vmatpush.msra.mxu1 %v1612_v38 }
  0x9f   :  { %1102 = vmatmul.msk.f32.gmra.mxu1 %vm186_vm1, %v1534_v42  ;;  %v218_v43 = vrot.slane %v1534_v42, 6  ;;  %v268_v44 = vrot.slane %v1534_v42, 7 }
  0xa0   :  { %422 = vmatpush.msra.mxu1 %v1623_v40 }
  0xa1   :  { %v219_v45 = vsel %vm216_vm2, %v217_v35, %v218_v43  ;;  %v269_v46 = vsel %vm266_vm3, %v267_v36, %v268_v44  ;;  %v1601_v36 = vld [vmem:[%s2142_s4] sm:$0xff] }
  0xa2   :  { %v226_v47 = vsel %vm139_vm4, 1.0, %v219_v45  ;;  %v276_v48 = vsel %vm138_vm5, 1.0, %v269_v46  ;;  %395 = vmatpush.msra.mxu0 %v1601_v36  ;;  %v1641_v46 = vld [vmem:[%s2139_s1] sm:$0xff] }
  0xa3   :  { %1104 = vmatmul.msk.f32.gmra.mxu2 %vm186_vm1, %v226_v47  ;;  %1114 = vmatmul.msk.f32.gmra.mxu3 %vm186_vm1, %v276_v48  ;;  %v1646_v47 = vld [vmem:[%s2139_s1 + $0x30] sm:$0xff]  ;;  %v1653_v48 = vld [vmem:[%s2139_s1 + $0x28] sm:$0xff] }
  0xa4   :  { %423 = vmatpush.msra.mxu1 %v1641_v46  ;;  %444 = vmatpush.msrb.mxu2 %v1646_v47 }
  0xa6   :  { %445 = vmatpush.msrb.mxu2 %v1653_v48 }
 0x114   :  { %v210_v49 = vpop.f32.mrf.mxu1 }
 0x115   :  { %v211_v51 = vadd.f32 %v1174_v50, %v210_v49  ;;  %v1659_v49 = vld [vmem:[%s2139_s1 + $0x20] sm:$0xff]  ;;  %s1347_s1 = smov [#allocation8]  }
 0x116   :  { %446 = vmatpush.msrb.mxu2 %v1659_v49  ;;  %s1057_s16 = sshll.u32 %s1347_s1, 4  ;;  %s1058_s16 = int_to_ptr.vmem [resolvable:$true] %s1057_s16 }
 0x11c   :  { %v213_v56 = vpop.f32.mrf.mxu1 }
 0x11d   :  { %v214_v58 = vadd.f32 %v1174_v50, %v213_v56  ;;  %v1662_v50 = vld [vmem:[#allocation7 + $0x1] ss:$0 sm:$0xff] }
 0x11e   :  { %v258_v52 = vpop.f32.mrf.mxu2  ;;  %v309_v53 = vpop.f32.mrf.mxu3 }
 0x11f   :  { %v264_v54 = vadd.f32 %v258_v52, %v211_v51  ;;  %v1665_v51 = vmul.f32 0.70710677, %v1447_v8  ;;  %v1677_v8 = vand.u32 127, %v133_v30  ;;  %v1692_v30 = vld [vmem:[%s2140_s2 + $0x70] sm:$0xff] }
 0x121   :  { %v1548_v55 = vadd.f32 %v309_v53, %v264_v54  ;;  %2157 = vst [vmem:[#allocation16_spill] sm:$0xff] %v1677_v8  ;;  %vm135_vm14 = vcmp.lt.s32.totalorder %v1677_v8, 10 }
 0x123   :  { %v1115_v57 = vmul.f32 -1.442695, %v1548_v55 }
 0x125   :  { %1180 = vpow2.f32 %v1115_v57 }
 0x126   :  { %v261_v59 = vpop.f32.mrf.mxu2  ;;  %v312_v63 = vpop.f32.mrf.mxu3 }
 0x127   :  { %v265_v60 = vadd.f32 %v261_v59, %v214_v58 }
 0x129   :  { %v1562_v0 = vadd.f32 %v312_v63, %v265_v60 }
 0x12b   :  { %v1181_v2 = vpop.eup %1180  ;;  %v1116_v3 = vmul.f32 -1.442695, %v1562_v0 }
 0x12c   :  { %v323_v5 = vadd.f32 1.0, %v1181_v2  ;;  %v1698_v2 = vld [vmem:[%s2140_s2 + $0x68] sm:$0xff] }
 0x12d   :  { %1182 = vpow2.f32 %v1116_v3  ;;  %v1704_v3 = vld [vmem:[%s2140_s2 + $0x60] sm:$0xff] }
 0x12e   :  { %1184 = vrcp.f32 %v323_v5  ;;  %v336_v15 = vand.u32 2147483648, %v323_v5  ;;  %v334_v18 = vand.u32 2147483647, %v323_v5  ;;  %vm330_vm7 = vweird.f32 %v323_v5 }
 0x130   :  { %v337_v21 = vor.u32 1.1754944e-38, %v336_v15  ;;  %vm335_vm9 = vcmp.eq.f32.partialorder %v334_v18, 8.507059e+37 }
 0x133   :  { %v1183_v10 = vpop.eup %1182 }
 0x134   :  { %v1185_v11 = vpop.eup %1184  ;;  %v324_v12 = vadd.f32 1.0, %v1183_v10  ;;  %v1710_v10 = vld [vmem:[%s2140_s2 + $0x58] sm:$0xff] }
 0x135   :  { %v326_v13 = vmul.f32 %v1185_v11, %v323_v5  ;;  %vm331_vm6 = vweird.f32 %v1185_v11 }
 0x136   :  { %1186 = vrcp.f32 %v324_v12  ;;  %vm332_vm8 = vmor %vm330_vm7, %vm331_vm6  ;;  %v351_v26 = vand.u32 2147483648, %v324_v12  ;;  %v349_v28 = vand.u32 2147483647, %v324_v12  ;;  %vm345_vm11 = vweird.f32 %v324_v12 }
 0x137   :  { %v327_v14 = vsub.f32 1.0, %v326_v13 }
 0x138   :  { %v352_v31 = vor.u32 1.1754944e-38, %v351_v26  ;;  %vm350_vm13 = vcmp.eq.f32.partialorder %v349_v28, 8.507059e+37  ;;  %v1764_v26 = vld [vmem:[%s2140_s2 + $0xe8] sm:$0xff]  ;;  %v1776_v28 = vld [vmem:[%s2140_s2 + $0xe0] sm:$0xff] }
 0x139   :  { %v328_v16 = vmul.f32 %v1185_v11, %v327_v14 }
 0x13b   :  { %v329_v19 = vadd.f32 %v1185_v11, %v328_v16 }
 0x13c   :  { %v1187_v20 = vpop.eup %1186 }
 0x13d   :  { %v333_v22 = vsel %vm332_vm8, %v1185_v11, %v329_v19  ;;  %v341_v23 = vmul.f32 %v1187_v20, %v324_v12  ;;  %vm346_vm10 = vweird.f32 %v1187_v20  ;;  %v1716_v12 = vld [vmem:[%s2140_s2 + $0x50] sm:$0xff] }
 0x13e   :  { %v338_v24 = vsel %vm335_vm9, %v337_v21, %v333_v22  ;;  %vm347_vm12 = vmor %vm345_vm11, %vm346_vm10  ;;  %v1735_v21 = vld [vmem:[%s2140_s2 + $0x40] sm:$0xff]  ;;  %v1740_v22 = vld [vmem:[%s2140_s2 + $0xf8] sm:$0xff] }
 0x13f   :  { %357 = vrot.lane.b32.xlu0 %v338_v24, %s1345_s19  ;;  %v342_v25 = vsub.f32 1.0, %v341_v23  ;;  %519 = vmatpush.msrb.mxu0 %v1740_v22  ;;  %v1747_v23 = vld [vmem:[%s2140_s2 + $0x38] sm:$0xff]  ;;  %v1752_v24 = vld [vmem:[%s2140_s2 + $0xf0] sm:$0xff] }
 0x141   :  { %v343_v27 = vmul.f32 %v1187_v20, %v342_v25  ;;  %520 = vmatpush.msrb.mxu0 %v1752_v24  ;;  %v1759_v25 = vld [vmem:[%s2140_s2 + $0x30] sm:$0xff] }
 0x143   :  { %v344_v29 = vadd.f32 %v1187_v20, %v343_v27  ;;  %521 = vmatpush.msrb.mxu0 %v1764_v26  ;;  %v1771_v27 = vld [vmem:[%s2140_s2 + $0x28] sm:$0xff] }
 0x145   :  { %v348_v33 = vsel %vm347_vm12, %v1187_v20, %v344_v29  ;;  %v1729_v20 = vld [vmem:[%s2140_s2 + $0x48] sm:$0xff]  ;;  %522 = vmatpush.msrb.mxu0 %v1776_v28  ;;  %v1783_v29 = vld [vmem:[%s2140_s2 + $0x20] sm:$0xff] }
 0x146   :  { %v353_v35 = vsel %vm350_vm13, %v352_v31, %v348_v33  ;;  %v1788_v31 = vld [vmem:[%s2140_s2 + $0xd8] sm:$0xff] }
 0x147   :  { %359 = vrot.lane.b32.xlu0 %v353_v35, %s1345_s19  ;;  %523 = vmatpush.msrb.mxu0 %v1788_v31  ;;  %v1795_v33 = vld [vmem:[%s2140_s2 + $0x18] sm:$0xff]  ;;  %v1800_v35 = vld [vmem:[%s2140_s2 + $0xd0] sm:$0xff] }
 0x149   :  { %524 = vmatpush.msrb.mxu0 %v1800_v35 }
 0x1b1   :  { %v358_v41 = vpop.permute.xlu0 %357 }
 0x1b2   :  { %v1629_v43 = vmul.f32 %v358_v41, %v1548_v55  ;;  %v1671_v55 = vmul.f32 0.70710677, %v1475_v17  ;;  %v1807_v41 = vld [vmem:[%s2140_s2 + $0x10] sm:$0xff] }
 0x1b4   :  { %1117 = vmatmul.msk.f32.vlgmr.msra.gmra.mxu0 %vm186_vm1, %v1629_v43  ;;  %2156 = vst [vmem:[#allocation15_spill] sm:$0xff] %v1671_v55 }
 0x1b9   :  { %v360_v44 = vpop.permute.xlu0 %359 }
 0x1ba   :  { %v1634_v45 = vmul.f32 %v360_v44, %v1562_v0  ;;  %v1687_v0 = vld [vmem:[%s2140_s2 + $0x78] sm:$0xff]  ;;  %v1812_v44 = vld [vmem:[%s2140_s2 + $0xc8] sm:$0xff] }
 0x1bb   :  { %499 = vmatpush.msrb.mxu3 %v1687_v0  ;;  %525 = vmatpush.msrb.mxu0 %v1812_v44 }
 0x1bc   :  { %1118 = vmatmul.msk.f32.gmra.mxu0 %vm186_vm1, %v1634_v45 }
 0x1bd   :  { %500 = vmatpush.msrb.mxu3 %v1692_v30 }
 0x1bf   :  { %501 = vmatpush.msrb.mxu3 %v1698_v2 }
 0x1c1   :  { %502 = vmatpush.msrb.mxu3 %v1704_v3 }
 0x1c3   :  { %503 = vmatpush.msrb.mxu3 %v1710_v10 }
 0x1c5   :  { %504 = vmatpush.msrb.mxu3 %v1716_v12 }
 0x1c7   :  { %505 = vmatpush.msrb.mxu3 %v1729_v20 }
 0x1c9   :  { %506 = vmatpush.msrb.mxu3 %v1735_v21 }
 0x1cb   :  { %507 = vmatpush.msrb.mxu3 %v1747_v23 }
 0x1cd   :  { %508 = vmatpush.msrb.mxu3 %v1759_v25 }
 0x1cf   :  { %509 = vmatpush.msrb.mxu3 %v1771_v27 }
 0x1d1   :  { %510 = vmatpush.msrb.mxu3 %v1783_v29 }
 0x1d3   :  { %511 = vmatpush.msrb.mxu3 %v1795_v33 }
 0x1d5   :  { %512 = vmatpush.msrb.mxu3 %v1807_v41 }
 0x231   :  { %v397_v52 = vpop.f32.mrf.mxu0 }
 0x232   :  { %v398_v53 = vadd.f32 %v1662_v50, %v397_v52  ;;  %v1819_v52 = vld [vmem:[%s2140_s2 + $0x8] sm:$0xff] }
 0x233   :  { %513 = vmatpush.msrb.mxu3 %v1819_v52 }
 0x234   :  { %v403_v54 = vadd.f32 %v398_v53, %v1665_v51  ;;  %v1824_v53 = vld [vmem:[%s2140_s2 + $0xc0] sm:$0xff] }
 0x235   :  { %526 = vmatpush.msrb.mxu0 %v1824_v53 }
 0x236   :  { %1119 = vmatmul.msk.f32.vlgmr.msra.gmra.mxu1 %vm145_vm0, %v403_v54  ;;  %v1831_v54 = vld [vmem:[%s2140_s2] sm:$0xff] }
 0x237   :  { %514 = vmatpush.msrb.mxu3 %v1831_v54 }
 0x239   :  { %v400_v56 = vpop.f32.mrf.mxu0  ;;  %787 = vmatpush.msra.mxu3 %v1554_v61  ;;  %v1864_v61 = vld [vmem:[%s2140_s2 + $0x98] sm:$0xff] }
 0x23a   :  { %v401_v57 = vadd.f32 %v1662_v50, %v400_v56  ;;  %v1836_v56 = vld [vmem:[%s2140_s2 + $0xb8] sm:$0xff] }
 0x23b   :  { %527 = vmatpush.msrb.mxu0 %v1836_v56  ;;  %788 = vmatpush.msra.mxu3 %v1559_v62  ;;  %v1869_v62 = vld [vmem:[%s2140_s2 + $0x90] sm:$0xff] }
 0x23c   :  { %v404_v58 = vadd.f32 %v401_v57, %v1671_v55  ;;  %v1843_v57 = vld [vmem:[%s2140_s2 + $0xb0] sm:$0xff] }
 0x23d   :  { %528 = vmatpush.msrb.mxu0 %v1843_v57  ;;  %789 = vmatpush.msra.mxu3 %v1567_v1  ;;  %v1876_v1 = vld [vmem:[%s2140_s2 + $0x88] sm:$0xff] }
 0x23e   :  { %1120 = vmatmul.msk.f32.vlgmr.msrb.gmra.mxu2 %vm145_vm0, %v404_v58  ;;  %v1850_v58 = vld [vmem:[%s2140_s2 + $0xa8] sm:$0xff] }
 0x23f   :  { %529 = vmatpush.msrb.mxu0 %v1850_v58  ;;  %790 = vmatpush.msra.mxu3 %v1574_v4 }
 0x241   :  { %791 = vmatpush.msra.mxu3 %v1580_v6  ;;  %v1892_v6 = vld [vmem:[%s2143_s5 + $0x18] sm:$0xff] }
 0x242   :  { %562 = vmatpush.msrb.mxu1 %v1892_v6 }
 0x243   :  { %792 = vmatpush.msra.mxu3 %v1586_v7  ;;  %v1905_v7 = vld [vmem:[%s2143_s5 + $0x8] sm:$0xff] }
 0x244   :  { %2159 = vst [vmem:[#allocation18_spill] sm:$0xff] %v1905_v7 }
 0x245   :  { %793 = vmatpush.msra.mxu3 %v1592_v9  ;;  %v1912_v9 = vld [vmem:[%s2143_s5] sm:$0xff] }
 0x246   :  { %2160 = vst [vmem:[#allocation19_spill] sm:$0xff] %v1912_v9 }
 0x247   :  { %794 = vmatpush.msra.mxu3 %v1601_v36 }
 0x2b3   :  { %v425_v59 = vpop.f32.mrf.mxu1 }
 0x2b4   :  { %v453_v60 = vsel %vm135_vm14, %v425_v59, -1e+30  ;;  %v1857_v59 = vld [vmem:[%s2140_s2 + $0xa0] sm:$0xff] }
 0x2b5   :  { %455 = vmax.xlane.f32.xlu1 %v453_v60  ;;  %530 = vmatpush.msrb.mxu0 %v1857_v59 }
 0x2b7   :  { %531 = vmatpush.msrb.mxu0 %v1864_v61 }
 0x2b9   :  { %532 = vmatpush.msrb.mxu0 %v1869_v62 }
 0x2bb   :  { %533 = vmatpush.msrb.mxu0 %v1876_v1 }
 0x2c1   :  { %v448_v63 = vpop.f32.mrf.mxu2 }
 0x2c2   :  { %v454_v17 = vsel %vm135_vm14, %v448_v63, -1e+30  ;;  %v1897_v63 = vld [vmem:[%s2143_s5 + $0x10] sm:$0xff] }
 0x2c3   :  { %457 = vmax.xlane.f32.xlu1 %v454_v17  ;;  %2158 = vst [vmem:[#allocation17_spill] sm:$0xff] %v1897_v63  ;;  %563 = vmatpush.msrb.mxu1 %v1897_v63 }
 0x2c5   :  { %564 = vmatpush.msrb.mxu1 %v1905_v7 }
 0x2c7   :  { %565 = vmatpush.msrb.mxu1 %v1912_v9 }
 0x328   :  { %v456_v5 = vpop.xlane.xlu1 %455 }
 0x329   :  { %v459_v11 = vsub.f32 %v453_v60, %v456_v5  ;;  %v1883_v60 = vld [vmem:[%s2140_s2 + $0x80] sm:$0xff] }
 0x32a   :  { %534 = vmatpush.msrb.mxu0 %v1883_v60 }
 0x32b   :  { %v461_v13 = vmul.f32 1.442695, %v459_v11 }
 0x32c   :  { %819 = vmatpush.msra.mxu0 %v1607_v37 }
 0x32d   :  { %1188 = vpow2.f32 %v461_v13 }
 0x32e   :  { %820 = vmatpush.msra.mxu0 %v1612_v38 }
 0x330   :  { %821 = vmatpush.msra.mxu0 %v1623_v40 }
 0x332   :  { %822 = vmatpush.msra.mxu0 %v1641_v46 }
 0x333   :  { %v1720_v14 = vpop.eup %1188 }
 0x334   :  { %465 = vadd.xlane.f32.xlu2 %v1720_v14 }
 0x336   :  { %v458_v15 = vpop.xlane.xlu1 %457 }
 0x337   :  { %v460_v16 = vsub.f32 %v454_v17, %v458_v15 }
 0x339   :  { %v463_v18 = vmul.f32 1.442695, %v460_v16 }
 0x33b   :  { %1190 = vpow2.f32 %v463_v18 }
 0x341   :  { %v1723_v19 = vpop.eup %1190 }
 0x342   :  { %467 = vadd.xlane.f32.xlu2 %v1723_v19 }
 0x3a7   :  { %v466_v4 = vpop.xlane.xlu2 %465 }
 0x3a8   :  { %1192 = vrcp.f32 %v466_v4  ;;  %v480_v5 = vand.u32 2147483648, %v466_v4  ;;  %v478_v11 = vand.u32 2147483647, %v466_v4  ;;  %vm474_vm6 = vweird.f32 %v466_v4 }
 0x3aa   :  { %v481_v16 = vor.u32 1.1754944e-38, %v480_v5  ;;  %vm479_vm8 = vcmp.eq.f32.partialorder %v478_v11, 8.507059e+37  ;;  %v1137_v11 = vld [vmem:[%s2146_s8 + $0xe0] sm:$0xff] }
 0x3ae   :  { %v1193_v36 = vpop.eup %1192 }
 0x3af   :  { %v470_v37 = vmul.f32 %v1193_v36, %v466_v4  ;;  %vm475_vm15 = vweird.f32 %v1193_v36 }
 0x3b0   :  { %vm476_vm7 = vmor %vm474_vm6, %vm475_vm15 }
 0x3b1   :  { %v471_v17 = vsub.f32 1.0, %v470_v37 }
 0x3b3   :  { %v472_v38 = vmul.f32 %v1193_v36, %v471_v17 }
 0x3b5   :  { %v468_v13 = vpop.xlane.xlu2 %467  ;;  %v473_v15 = vadd.f32 %v1193_v36, %v472_v38 }
 0x3b6   :  { %1194 = vrcp.f32 %v468_v13  ;;  %v495_v37 = vand.u32 2147483648, %v468_v13  ;;  %v493_v17 = vand.u32 2147483647, %v468_v13  ;;  %vm489_vm10 = vweird.f32 %v468_v13 }
 0x3b7   :  { %v477_v40 = vsel %vm476_vm7, %v1193_v36, %v473_v15  ;;  %v1136_v15 = vld [vmem:[%s2146_s8 + $0xd8] sm:$0xff] }
 0x3b8   :  { %v482_v18 = vsel %vm479_vm8, %v481_v16, %v477_v40  ;;  %v496_v63 = vor.u32 1.1754944e-38, %v495_v37  ;;  %vm494_vm12 = vcmp.eq.f32.partialorder %v493_v17, 8.507059e+37  ;;  %v1123_v16 = vld [vmem:[%s2146_s8 + $0x140] sm:$0xff]  ;;  %v1135_v40 = vld [vmem:[%s2146_s8 + $0xd0] sm:$0xff] }
 0x3b9   :  { %v483_v8 = vmul.f32 %v1720_v14, %v482_v18  ;;  %v1150_v18 = vld [vmem:[%s2146_s8 + $0x138] sm:$0xff]  ;;  %v1149_v37 = vld [vmem:[%s2146_s8 + $0x130] sm:$0xff]  ;;  %v1133_v17 = vld [vmem:[%s2146_s8 + $0xc0] sm:$0xff] }
 0x3bb   :  { %515 = vmatmul.f32.vlgmr.msrb.gmra.mxu3 %v483_v8  ;;  %v1129_v8 = vld [vmem:[%s2146_s8 + $0x170] sm:$0xff] }
 0x3bc   :  { %v1195_v46 = vpop.eup %1194 }
 0x3bd   :  { %v485_v55 = vmul.f32 %v1195_v46, %v468_v13  ;;  %vm490_vm9 = vweird.f32 %v1195_v46  ;;  %v1124_v13 = vld [vmem:[%s2146_s8 + $0x148] sm:$0xff] }
 0x3be   :  { %vm491_vm11 = vmor %vm489_vm10, %vm490_vm9 }
 0x3bf   :  { %v486_v9 = vsub.f32 1.0, %v485_v55  ;;  %v1130_v55 = vld [vmem:[%s2146_s8 + $0x178] sm:$0xff] }
 0x3c0   :  { %606 = vmatpush.msra.mxu2 %v1130_v55 }
 0x3c1   :  { %v487_v7 = vmul.f32 %v1195_v46, %v486_v9  ;;  %v1125_v9 = vld [vmem:[%s2146_s8 + $0x150] sm:$0xff] }
 0x3c2   :  { %607 = vmatpush.msra.mxu2 %v1129_v8 }
 0x3c3   :  { %v488_v4 = vadd.f32 %v1195_v46, %v487_v7  ;;  %v1138_v7 = vld [vmem:[%s2146_s8 + $0xe8] sm:$0xff] }
 0x3c5   :  { %v492_v5 = vsel %vm491_vm11, %v1195_v46, %v488_v4  ;;  %v1134_v46 = vld [vmem:[%s2146_s8 + $0xc8] sm:$0xff] }
 0x3c6   :  { %v497_v38 = vsel %vm494_vm12, %v496_v63, %v492_v5  ;;  %v1126_v63 = vld [vmem:[%s2146_s8 + $0x158] sm:$0xff]  ;;  %v1148_v4 = vld [vmem:[%s2146_s8 + $0x128] sm:$0xff]  ;;  %v1147_v5 = vld [vmem:[%s2146_s8 + $0x120] sm:$0xff] }
 0x3c7   :  { %v498_v36 = vmul.f32 %v1723_v19, %v497_v38  ;;  %v1139_v19 = vld [vmem:[%s2146_s8 + $0xf0] sm:$0xff]  ;;  %v1146_v38 = vld [vmem:[%s2146_s8 + $0x118] sm:$0xff] }
 0x3c9   :  { %535 = vmatmul.f32.vlgmr.msrb.gmra.mxu0 %v498_v36  ;;  %v1145_v36 = vld [vmem:[%s2146_s8 + $0x110] sm:$0xff] }
 0x3ca   :  { %842 = vmatpush.msrb.mxu0 %v1618_v39 }
 0x3cc   :  { %843 = vmatpush.msrb.mxu0 %v1646_v47  ;;  %v1128_v47 = vld [vmem:[%s2146_s8 + $0x168] sm:$0xff] }
 0x3cd   :  { %608 = vmatpush.msra.mxu2 %v1128_v47 }
 0x3ce   :  { %844 = vmatpush.msrb.mxu0 %v1653_v48  ;;  %v1140_v48 = vld [vmem:[%s2146_s8 + $0xf8] sm:$0xff] }
 0x3cf   :  { %652 = vmatpush.msra.mxu1 %v1140_v48 }
 0x3d0   :  { %845 = vmatpush.msrb.mxu0 %v1659_v49  ;;  %v1127_v49 = vld [vmem:[%s2146_s8 + $0x160] sm:$0xff] }
 0x3d1   :  { %609 = vmatpush.msra.mxu2 %v1127_v49  ;;  %653 = vmatpush.msra.mxu1 %v1139_v19 }
 0x3d3   :  { %610 = vmatpush.msra.mxu2 %v1126_v63  ;;  %654 = vmatpush.msra.mxu1 %v1138_v7 }
 0x3d5   :  { %611 = vmatpush.msra.mxu2 %v1125_v9  ;;  %655 = vmatpush.msra.mxu1 %v1137_v11 }
 0x3d7   :  { %612 = vmatpush.msra.mxu2 %v1124_v13  ;;  %656 = vmatpush.msra.mxu1 %v1136_v15 }
 0x3d9   :  { %613 = vmatpush.msra.mxu2 %v1123_v16  ;;  %657 = vmatpush.msra.mxu1 %v1135_v40 }
 0x3db   :  { %700 = vmatpush.msrb.mxu2 %v1150_v18  ;;  %658 = vmatpush.msra.mxu1 %v1134_v46 }
 0x3dd   :  { %701 = vmatpush.msrb.mxu2 %v1149_v37  ;;  %659 = vmatpush.msra.mxu1 %v1133_v17 }
 0x3df   :  { %702 = vmatpush.msrb.mxu2 %v1148_v4 }
 0x3e1   :  { %703 = vmatpush.msrb.mxu2 %v1147_v5 }
 0x3e3   :  { %704 = vmatpush.msrb.mxu2 %v1146_v38 }
 0x3e5   :  { %705 = vmatpush.msrb.mxu2 %v1145_v36 }
 0x43e   :  { %v516_v14 = vpop.f32.mrf.mxu3 }
 0x43f   :  { %1121 = vmatmul.msk.f32.vlgmr.msrb.gmra.mxu1 %vm145_vm0, %v516_v14 }
 0x440   :  { %896 = vmatpush.msrb.mxu1 %v1687_v0  ;;  %v1144_v0 = vld [vmem:[%s2146_s8 + $0x108] sm:$0xff] }
 0x441   :  { %706 = vmatpush.msrb.mxu2 %v1144_v0 }
 0x442   :  { %897 = vmatpush.msrb.mxu1 %v1692_v30  ;;  %v1143_v30 = vld [vmem:[%s2146_s8 + $0x100] sm:$0xff] }
 0x443   :  { %707 = vmatpush.msrb.mxu2 %v1143_v30 }
 0x444   :  { %898 = vmatpush.msrb.mxu1 %v1698_v2  ;;  %v2005_v2 = vld [vmem:[#allocation7 + $0x2] ss:$0 sm:$0xff] }
 0x446   :  { %v536_v39 = vpop.f32.mrf.mxu0  ;;  %899 = vmatpush.msrb.mxu1 %v1704_v3 }
 0x447   :  { %1122 = vmatmul.msk.f32.gmra.mxu1 %vm145_vm0, %v536_v39 }
 0x448   :  { %900 = vmatpush.msrb.mxu1 %v1710_v10 }
 0x44a   :  { %901 = vmatpush.msrb.mxu1 %v1716_v12 }
 0x44c   :  { %902 = vmatpush.msrb.mxu1 %v1729_v20 }
 0x44e   :  { %903 = vmatpush.msrb.mxu1 %v1735_v21 }
 0x450   :  { %904 = vmatpush.msrb.mxu1 %v1747_v23 }
 0x452   :  { %905 = vmatpush.msrb.mxu1 %v1759_v25 }
 0x454   :  { %906 = vmatpush.msrb.mxu1 %v1771_v27 }
 0x456   :  { %907 = vmatpush.msrb.mxu1 %v1783_v29 }
 0x458   :  { %908 = vmatpush.msrb.mxu1 %v1795_v33 }
 0x45a   :  { %909 = vmatpush.msrb.mxu1 %v1807_v41 }
 0x45c   :  { %910 = vmatpush.msrb.mxu1 %v1819_v52 }
 0x45e   :  { %911 = vmatpush.msrb.mxu1 %v1831_v54 }
 0x4bc   :  { %v567_v3 = vpop.f32.mrf.mxu1 }
 0x4bd   :  { %v568_v55 = vadd.f32 %v2005_v2, %v567_v3 }
 0x4bf   :  { %v573_v8 = vadd.f32 %v568_v55, %v1629_v43 }
 0x4c1   :  { %v575_v10 = vmul.f32 0.70710677, %v573_v8 }
 0x4c3   :  { %v577_v12 = vadd.f32 %v575_v10, %v1518_v34 }
 0x4c4   :  { %v570_v20 = vpop.f32.mrf.mxu1 }
 0x4c5   :  { %v2016_v21 = vmul.f32 0.70710677, %v577_v12  ;;  %v571_v23 = vadd.f32 %v2005_v2, %v570_v20 }
 0x4c7   :  { %v574_v25 = vadd.f32 %v571_v23, %v1634_v45  ;;  %1131 = vmatmul.msk.f32.vlgmr.msra.gmra.mxu2 %vm186_vm1, %v2016_v21  ;;  %v621_v43 = vrot.slane %v2016_v21, 6  ;;  %v669_v41 = vrot.slane %v2016_v21, 7 }
 0x4c8   :  { %916 = vmatpush.msra.mxu2 %v1740_v22 }
 0x4c9   :  { %v576_v34 = vmul.f32 0.70710677, %v574_v25  ;;  %v626_v27 = vsel %vm216_vm2, 1.0, %v621_v43 }
 0x4ca   :  { %v627_v29 = vsel %vm139_vm4, 1.0, %v626_v27  ;;  %917 = vmatpush.msra.mxu2 %v1752_v24 }
 0x4cb   :  { %v578_v45 = vadd.f32 %v576_v34, %v1534_v42  ;;  %1141 = vmatmul.msk.f32.vlgmr.msra.gmra.mxu1 %vm186_vm1, %v627_v29  ;;  %v2161_v29 = vld [vmem:[#allocation17_spill] sm:$0xff] }
 0x4cc   :  { %918 = vmatpush.msra.mxu2 %v1764_v26  ;;  %v674_v26 = vsel %vm266_vm3, 1.0, %v669_v41 }
 0x4cd   :  { %v2034_v33 = vmul.f32 0.70710677, %v578_v45 }
 0x4ce   :  { %919 = vmatpush.msra.mxu2 %v1776_v28  ;;  %v675_v28 = vsel %vm138_vm5, 1.0, %v674_v26 }
 0x4cf   :  { %1132 = vmatmul.msk.f32.gmra.mxu2 %vm186_vm1, %v2034_v33  ;;  %v622_v22 = vrot.slane %v2034_v33, 6 }
 0x4d0   :  { %920 = vmatpush.msra.mxu2 %v1788_v31  ;;  %v670_v31 = vrot.slane %v2034_v33, 7 }
 0x4d1   :  { %v623_v24 = vsel %vm216_vm2, %v621_v43, %v622_v22  ;;  %v2162_v22 = vld [vmem:[#allocation18_spill] sm:$0xff] }
 0x4d2   :  { %v628_v42 = vsel %vm139_vm4, 1.0, %v623_v24  ;;  %921 = vmatpush.msra.mxu2 %v1800_v35  ;;  %v671_v35 = vsel %vm266_vm3, %v669_v41, %v670_v31  ;;  %v2163_v41 = vld [vmem:[#allocation15_spill] sm:$0xff] }
 0x4d3   :  { %1142 = vmatmul.msk.f32.gmra.mxu1 %vm186_vm1, %v628_v42  ;;  %v2164_v42 = vld [vmem:[#allocation19_spill] sm:$0xff] }
 0x4d4   :  { %922 = vmatpush.msra.mxu2 %v1812_v44  ;;  %v676_v44 = vsel %vm138_vm5, 1.0, %v671_v35 }
 0x4d6   :  { %923 = vmatpush.msra.mxu2 %v1824_v53  ;;  %v1177_v53 = vld [vmem:[#allocation7 + $0x6] ss:$0 sm:$0xff] }
 0x4d7   :  { %1151 = vmatmul.msk.f32.vlgmr.msrb.gmra.mxu2 %vm186_vm1, %v675_v28 }
 0x4d8   :  { %924 = vmatpush.msra.mxu2 %v1836_v56 }
 0x4da   :  { %925 = vmatpush.msra.mxu2 %v1843_v57 }
 0x4dc   :  { %926 = vmatpush.msra.mxu2 %v1850_v58 }
 0x4de   :  { %927 = vmatpush.msra.mxu2 %v1857_v59 }
 0x4df   :  { %1152 = vmatmul.msk.f32.gmra.mxu2 %vm186_vm1, %v676_v44 }
 0x4e0   :  { %928 = vmatpush.msra.mxu2 %v1864_v61 }
 0x4e2   :  { %929 = vmatpush.msra.mxu2 %v1869_v62 }
 0x4e4   :  { %930 = vmatpush.msra.mxu2 %v1876_v1 }
 0x4e6   :  { %931 = vmatpush.msra.mxu2 %v1883_v60 }
 0x548   :  { %v661_v57 = vpop.f32.mrf.mxu1 }
 0x54a   :  { %v615_v52 = vpop.f32.mrf.mxu2 }
 0x54b   :  { %v616_v56 = vadd.f32 %v1177_v53, %v615_v52 }
 0x54d   :  { %v667_v58 = vadd.f32 %v661_v57, %v616_v56 }
 0x550   :  { %v664_v47 = vpop.f32.mrf.mxu1 }
 0x552   :  { %v618_v54 = vpop.f32.mrf.mxu2 }
 0x553   :  { %v619_v39 = vadd.f32 %v1177_v53, %v618_v54 }
 0x555   :  { %v668_v48 = vadd.f32 %v664_v47, %v619_v39 }
 0x55a   :  { %v709_v32 = vpop.f32.mrf.mxu2 }
 0x55b   :  { %v715_v14 = vadd.f32 %v709_v32, %v667_v58 }
 0x55d   :  { %v1153_v59 = vmul.f32 -1.442695, %v715_v14 }
 0x55f   :  { %1196 = vpow2.f32 %v1153_v59 }
 0x562   :  { %v712_v61 = vpop.f32.mrf.mxu2 }
 0x563   :  { %v716_v49 = vadd.f32 %v712_v61, %v668_v48 }
 0x565   :  { %v1197_v62 = vpop.eup %1196  ;;  %v1154_v19 = vmul.f32 -1.442695, %v716_v49 }
 0x566   :  { %v723_v1 = vadd.f32 1.0, %v1197_v62 }
 0x567   :  { %1198 = vpow2.f32 %v1154_v19 }
 0x568   :  { %1200 = vrcp.f32 %v723_v1  ;;  %v736_v13 = vand.u32 2147483648, %v723_v1  ;;  %v734_v16 = vand.u32 2147483647, %v723_v1  ;;  %vm730_vm3 = vweird.f32 %v723_v1 }
 0x56a   :  { %v737_v46 = vor.u32 1.1754944e-38, %v736_v13  ;;  %vm735_vm5 = vcmp.eq.f32.partialorder %v734_v16, 8.507059e+37 }
 0x56d   :  { %v1199_v60 = vpop.eup %1198 }
 0x56e   :  { %v1201_v63 = vpop.eup %1200  ;;  %v724_v7 = vadd.f32 1.0, %v1199_v60 }
 0x56f   :  { %v726_v9 = vmul.f32 %v1201_v63, %v723_v1  ;;  %vm731_vm2 = vweird.f32 %v1201_v63 }
 0x570   :  { %1202 = vrcp.f32 %v724_v7  ;;  %vm732_vm4 = vmor %vm730_vm3, %vm731_vm2  ;;  %v751_v38 = vand.u32 2147483648, %v724_v7  ;;  %v749_v0 = vand.u32 2147483647, %v724_v7  ;;  %vm745_vm15 = vweird.f32 %v724_v7 }
 0x571   :  { %v727_v11 = vsub.f32 1.0, %v726_v9 }
 0x572   :  { %v752_v3 = vor.u32 1.1754944e-38, %v751_v38  ;;  %vm750_vm7 = vcmp.eq.f32.partialorder %v749_v0, 8.507059e+37  ;;  %v981_v0 = vld [vmem:[%s2144_s6 + $0x20] sm:$0xff] }
 0x573   :  { %v728_v15 = vmul.f32 %v1201_v63, %v727_v11 }
 0x575   :  { %v729_v40 = vadd.f32 %v1201_v63, %v728_v15 }
 0x576   :  { %v1203_v18 = vpop.eup %1202 }
 0x577   :  { %v733_v37 = vsel %vm732_vm4, %v1201_v63, %v729_v40  ;;  %v741_v17 = vmul.f32 %v1203_v18, %v724_v7  ;;  %vm746_vm13 = vweird.f32 %v1203_v18 }
 0x578   :  { %v738_v4 = vsel %vm735_vm5, %v737_v46, %v733_v37  ;;  %vm747_vm6 = vmor %vm745_vm15, %vm746_vm13 }
 0x579   :  { %757 = vrot.lane.b32.xlu0 %v738_v4, %s1345_s19  ;;  %v742_v5 = vsub.f32 1.0, %v741_v17  ;;  %v984_v17 = vld [vmem:[%s2144_s6 + $0x38] sm:$0xff]  ;;  %v983_v4 = vld [vmem:[%s2144_s6 + $0x30] sm:$0xff] }
 0x57a   :  { %1000 = vmatpush.msrb.mxu3 %v984_v17 }
 0x57b   :  { %v743_v36 = vmul.f32 %v1203_v18, %v742_v5 }
 0x57c   :  { %1001 = vmatpush.msrb.mxu3 %v983_v4 }
 0x57d   :  { %v744_v30 = vadd.f32 %v1203_v18, %v743_v36  ;;  %v982_v36 = vld [vmem:[%s2144_s6 + $0x28] sm:$0xff] }
 0x57e   :  { %1002 = vmatpush.msrb.mxu3 %v982_v36 }
 0x57f   :  { %v748_v55 = vsel %vm747_vm6, %v1203_v18, %v744_v30  ;;  %v980_v30 = vld [vmem:[%s2144_s6 + $0x18] sm:$0xff] }
 0x580   :  { %v753_v8 = vsel %vm750_vm7, %v752_v3, %v748_v55  ;;  %1003 = vmatpush.msrb.mxu3 %v981_v0  ;;  %v979_v3 = vld [vmem:[%s2144_s6 + $0x10] sm:$0xff]  ;;  %v978_v55 = vld [vmem:[%s2144_s6 + $0x8] sm:$0xff] }
 0x581   :  { %759 = vrot.lane.b32.xlu1 %v753_v8, %s1345_s19  ;;  %v977_v8 = vld [vmem:[%s2144_s6] sm:$0xff]  ;;  %s1346_s6 = smov [#allocation9]  }
 0x582   :  { %1004 = vmatpush.msrb.mxu3 %v980_v30  ;;  %s1070_s13 = sshll.u32 %s1346_s6, 4  ;;  %s1071_s13 = int_to_ptr.vmem [resolvable:$true] %s1070_s13 }
 0x584   :  { %1005 = vmatpush.msrb.mxu3 %v979_v3 }
 0x586   :  { %1006 = vmatpush.msrb.mxu3 %v978_v55 }
 0x588   :  { %1007 = vmatpush.msrb.mxu3 %v977_v8 }
 0x5eb   :  { %v758_v10 = vpop.permute.xlu0 %757 }
 0x5ec   :  { %v2068_v12 = vmul.f32 %v758_v10, %v715_v14  ;;  %v1018_v10 = vld [vmem:[#allocation5 + $0x18] sm:$0xff] }
 0x5ee   :  { %1155 = vmatmul.msk.f32.vlgmr.msra.gmra.mxu3 %vm186_vm1, %v2068_v12 }
 0x5f3   :  { %v760_v20 = vpop.permute.xlu1 %759 }
 0x5f4   :  { %v2072_v23 = vmul.f32 %v760_v20, %v716_v49  ;;  %v1017_v20 = vld [vmem:[#allocation5 + $0x10] sm:$0xff] }
 0x5f6   :  { %1156 = vmatmul.msk.f32.gmra.mxu3 %vm186_vm1, %v2072_v23 }
 0x671   :  { %v796_v25 = vpop.f32.mrf.mxu3 }
 0x672   :  { %v797_v43 = vadd.f32 %v1662_v50, %v796_v25 }
 0x674   :  { %v802_v34 = vadd.f32 %v797_v43, %v1665_v51 }
 0x676   :  { %1157 = vmatmul.msk.f32.vlgmr.msra.gmra.mxu0 %vm145_vm0, %v802_v34 }
 0x677   :  { %958 = vmatpush.msra.mxu0 %v1892_v6 }
 0x679   :  { %v799_v27 = vpop.f32.mrf.mxu3  ;;  %959 = vmatpush.msra.mxu0 %v2161_v29 }
 0x67a   :  { %v800_v45 = vadd.f32 %v1662_v50, %v799_v27 }
 0x67b   :  { %960 = vmatpush.msra.mxu0 %v2162_v22 }
 0x67c   :  { %v803_v24 = vadd.f32 %v800_v45, %v2163_v41 }
 0x67d   :  { %961 = vmatpush.msra.mxu0 %v2164_v42 }
 0x67e   :  { %1158 = vmatmul.msk.f32.vlgmr.msrb.gmra.mxu0 %vm145_vm0, %v803_v24 }
 0x67f   :  { %1038 = vmatpush.msrb.mxu0 %v1018_v10 }
 0x681   :  { %1039 = vmatpush.msrb.mxu0 %v1017_v20 }
 0x6f3   :  { %v824_v26 = vpop.f32.mrf.mxu0 }
 0x6f4   :  { %v850_v51 = vsel %vm135_vm14, %v824_v26, -1e+30 }
 0x6f5   :  { %852 = vmax.xlane.f32.xlu2 %v850_v51 }
 0x6fb   :  { %v847_v31 = vpop.f32.mrf.mxu0 }
 0x6fc   :  { %v851_v6 = vsel %vm135_vm14, %v847_v31, -1e+30  ;;  %v1178_v31 = vld [vmem:[#allocation7 + $0x3] ss:$0 sm:$0xff] }
 0x6fd   :  { %854 = vmax.xlane.f32.xlu0 %v851_v6 }
 0x768   :  { %v853_v35 = vpop.xlane.xlu2 %852 }
 0x769   :  { %v856_v50 = vsub.f32 %v850_v51, %v853_v35  ;;  %v1016_v51 = vld [vmem:[#allocation5 + $0x8] sm:$0xff] }
 0x76a   :  { %1040 = vmatpush.msrb.mxu0 %v1016_v51 }
 0x76b   :  { %v858_v44 = vmul.f32 1.442695, %v856_v50 }
 0x76d   :  { %1204 = vpow2.f32 %v858_v44 }
 0x770   :  { %v855_v52 = vpop.xlane.xlu0 %854 }
 0x771   :  { %v857_v53 = vsub.f32 %v851_v6, %v855_v52 }
 0x773   :  { %v1205_v54 = vpop.eup %1204  ;;  %v860_v56 = vmul.f32 1.442695, %v857_v53 }
 0x774   :  { %862 = vadd.xlane.f32.xlu2 %v1205_v54 }
 0x775   :  { %1206 = vpow2.f32 %v860_v56 }
 0x77b   :  { %v1207_v57 = vpop.eup %1206 }
 0x77c   :  { %864 = vadd.xlane.f32.xlu2 %v1207_v57 }
 0x7e7   :  { %v863_v58 = vpop.xlane.xlu2 %862 }
 0x7e8   :  { %1208 = vrcp.f32 %v863_v58  ;;  %v877_v47 = vand.u32 2147483648, %v863_v58  ;;  %v875_v61 = vand.u32 2147483647, %v863_v58  ;;  %vm871_vm8 = vweird.f32 %v863_v58 }
 0x7ea   :  { %v878_v19 = vor.u32 1.1754944e-38, %v877_v47  ;;  %vm876_vm10 = vcmp.eq.f32.partialorder %v875_v61, 8.507059e+37 }
 0x7ee   :  { %v1209_v32 = vpop.eup %1208 }
 0x7ef   :  { %v867_v14 = vmul.f32 %v1209_v32, %v863_v58  ;;  %v865_v39 = vpop.xlane.xlu2 %864  ;;  %vm872_vm14 = vweird.f32 %v1209_v32 }
 0x7f0   :  { %1210 = vrcp.f32 %v865_v39  ;;  %vm873_vm9 = vmor %vm871_vm8, %vm872_vm14  ;;  %v892_v11 = vand.u32 2147483648, %v865_v39  ;;  %v890_v15 = vand.u32 2147483647, %v865_v39  ;;  %vm886_vm12 = vweird.f32 %v865_v39 }
 0x7f1   :  { %v868_v59 = vsub.f32 1.0, %v867_v14 }
 0x7f2   :  { %v893_v40 = vor.u32 1.1754944e-38, %v892_v11  ;;  %vm891_vm3 = vcmp.eq.f32.partialorder %v890_v15, 8.507059e+37 }
 0x7f3   :  { %v869_v48 = vmul.f32 %v1209_v32, %v868_v59 }
 0x7f5   :  { %v870_v49 = vadd.f32 %v1209_v32, %v869_v48 }
 0x7f6   :  { %v1211_v62 = vpop.eup %1210 }
 0x7f7   :  { %v882_v1 = vmul.f32 %v1211_v62, %v865_v39  ;;  %v874_v60 = vsel %vm873_vm9, %v1209_v32, %v870_v49  ;;  %vm887_vm11 = vweird.f32 %v1211_v62 }
 0x7f8   :  { %v879_v63 = vsel %vm876_vm10, %v878_v19, %v874_v60  ;;  %vm888_vm2 = vmor %vm886_vm12, %vm887_vm11 }
 0x7f9   :  { %v883_v7 = vsub.f32 1.0, %v882_v1  ;;  %v880_v9 = vmul.f32 %v1205_v54, %v879_v63 }
 0x7fb   :  { %v884_v13 = vmul.f32 %v1211_v62, %v883_v7  ;;  %912 = vmatmul.f32.vlgmr.msrb.gmra.mxu1 %v880_v9  ;;  %1051 = vst [vmem:[#allocation9] sm:$0xff] %v880_v9 }
 0x7fd   :  { %v885_v16 = vadd.f32 %v1211_v62, %v884_v13 }
 0x7ff   :  { %v889_v18 = vsel %vm888_vm2, %v1211_v62, %v885_v16 }
 0x800   :  { %v894_v46 = vsel %vm891_vm3, %v893_v40, %v889_v18 }
 0x801   :  { %v895_v37 = vmul.f32 %v1207_v57, %v894_v46 }
 0x803   :  { %932 = vmatmul.f32.vlgmr.msra.gmra.mxu2 %v895_v37  ;;  %1052 = vst [vmem:[#allocation9 + $0x8] sm:$0xff] %v895_v37 }
 0x804   :  { %1078 = dma.vmem_to_hbm [thread:$0]  %s1071_s13, 256, %s1073_s9, [#allocation10], %s1341_s25, %s1341_s25, %s1342_s26  }
 0x878   :  { %v913_v5 = vpop.f32.mrf.mxu1 }
 0x879   :  { %1159 = vmatmul.msk.f32.vlgmr.msra.gmra.mxu0 %vm145_vm0, %v913_v5 }
 0x886   :  { %v933_v38 = vpop.f32.mrf.mxu2 }
 0x887   :  { %1160 = vmatmul.msk.f32.gmra.mxu0 %vm145_vm0, %v933_v38 }
 0x8f6   :  { %v963_v25 = vpop.f32.mrf.mxu0 }
 0x8f7   :  { %v964_v43 = vadd.f32 %v2005_v2, %v963_v25 }
 0x8f9   :  { %v969_v34 = vadd.f32 %v964_v43, %v2068_v12  ;;  %v1015_v12 = vld [vmem:[#allocation5] sm:$0xff] }
 0x8fa   :  { %1041 = vmatpush.msrb.mxu0 %v1015_v12 }
 0x8fb   :  { %v971_v27 = vmul.f32 0.70710677, %v969_v34 }
 0x8fd   :  { %v973_v29 = vadd.f32 %v971_v27, %v2016_v21 }
 0x8ff   :  { %v975_v45 = vmul.f32 0.70710677, %v973_v29 }
 0x901   :  { %1161 = vmatmul.msk.f32.vlgmr.msrb.gmra.mxu3 %vm186_vm1, %v975_v45 }
 0x904   :  { %v966_v22 = vpop.f32.mrf.mxu0 }
 0x905   :  { %v967_v41 = vadd.f32 %v2005_v2, %v966_v22  ;;  %v1179_v2 = vld [vmem:[#allocation7 + $0x4] ss:$0 sm:$0xff] }
 0x907   :  { %v970_v24 = vadd.f32 %v967_v41, %v2072_v23 }
 0x909   :  { %v972_v42 = vmul.f32 0.70710677, %v970_v24 }
 0x90b   :  { %v974_v26 = vadd.f32 %v972_v42, %v2034_v33 }
 0x90d   :  { %v976_v28 = vmul.f32 0.70710677, %v974_v26 }
 0x90f   :  { %1162 = vmatmul.msk.f32.gmra.mxu3 %vm186_vm1, %v976_v28 }
 0x984   :  { %v1009_v21 = vpop.f32.mrf.mxu3 }
 0x985   :  { %v1010_v6 = vadd.f32 %v1178_v31, %v1009_v21 }
 0x987   :  { %1163 = vmatmul.msk.f32.vlgmr.msrb.gmra.mxu0 %vm145_vm0, %v1010_v6 }
 0x992   :  { %v1012_v35 = vpop.f32.mrf.mxu3 }
 0x993   :  { %v1013_v50 = vadd.f32 %v1178_v31, %v1012_v35 }
 0x995   :  { %1164 = vmatmul.msk.f32.gmra.mxu0 %vm145_vm0, %v1013_v50 }
 0xa04   :  { %v1043_v33 = vpop.f32.mrf.mxu0 }
 0xa05   :  { %v1044_v23 = vadd.f32 %v1179_v2, %v1043_v33 }
 0xa07   :  { %1049 = vst [vmem:[#allocation8] sm:$0xff] %v1044_v23 }
 0xa12   :  { %v1046_v44 = vpop.f32.mrf.mxu0 }
 0xa13   :  { %v1047_v52 = vadd.f32 %v1179_v2, %v1046_v44 }
 0xa15   :  { %1050 = vst [vmem:[#allocation8 + $0x8] sm:$0xff] %v1047_v52 }
 0xa16   :  { %1065 = dma.vmem_to_hbm [thread:$0]  %s1058_s16, 256, %s1060_s18, [#allocation4], %s1341_s25, %s1341_s25, %s1342_s26  }
 0xa17   :  { %1336 = dma.done.wait [#allocation4], 256  }
 0xa18   :  { %1337 = vsyncadd [#allocation4], 4294967040 }
 0xa19   :  { %1338 = dma.done.wait [#allocation10], 256  }
 0xa1a   :  { %1339 = vsyncadd [#allocation10], 4294967040 }
 0xa1b   :  { %1087 = vsyncpa [#allocation3], 1 }
 0xa1c   :  { %1088 = vsyncpa [#allocation6], 1 }
 0xa1d   :  { %1089 = vsyncpa [#allocation4], 1 }
 0xa1e   :  { %1090 = vsyncpa [#allocation10], 1 }

</bundles_post_ra>
